<compile_context>
chip_gen: v7x
topology: tpu7x:2x2x1
jax: 0.10.0
libtpu: 0.0.40
codegen_flags: <defaults>
</compile_context>

<pallas_src>
import functools

import numpy as np
import jax
import jax.numpy as jnp
from jax import lax
from jax.experimental import pallas as pl
from jax.experimental.pallas import tpu as pltpu

OVERLAP_CUTOFF = 40.0      # same role as PYSEQM's `overlap_cutoff`


def _vmem_limit_bytes(est_bytes):
    """VMEM limit with headroom: ~75% of physical (48 MiB on v7x, ~96 MiB on v5e/v6e)."""
    try:
        cap = int(pltpu.get_tpu_info().vmem_capacity_bytes)
    except Exception:
        cap = 64 << 20                       # conservative fallback (v7x per-TC VMEM)
    budget = (cap * 3) // 4                  # never request the full physical VMEM
    return int(min(max(2 * est_bytes, 32 << 20), budget))


# ----------------------------------------------------------------------------
# Fused Pallas kernel: pair scaling + H assembly + symmetrization, H written once.
#
# Per molecule m (one grid step):
#   dip_ref : (1, 4, 4*npair_mol)  dip[a, 4q+b] = gate*K * di[pair q][a, b]
#   frow_ref: (1, 1, N)            F[4J+b] = beta[J, 0 if b==0 else 1]   (lane layout)
#   fcol_ref: (1, N, 1)            same F, sublane layout (row factor)
#   out_ref : (1, N, N)            final symmetric H block for molecule m
#   u_scr   : (N, N) VMEM          strictly-upper block assembly buffer
# ----------------------------------------------------------------------------
def _build_h_kernel(dip_ref, frow_ref, fcol_ref, out_ref, u_scr, *, molsize, scale):
    N = 4 * molsize
    u_scr[...] = jnp.zeros_like(u_scr)

    # Upper-triangle block assembly: for row-atom I, its pair blocks (I, J), J>I are a
    # contiguous lane slice of dip (triu row-major order) -> static slices, no scatter.
    rs = 0                                              # per-molecule pair row start
    for I in range(molsize - 1):
        cnt = molsize - 1 - I                           # pairs (I, I+1..molsize-1)
        slab = dip_ref[0, :, 4 * rs:4 * (rs + cnt)]     # (4, 4*cnt)
        rbeta = fcol_ref[0, 4 * I:4 * I + 4, :]         # (4, 1)  beta_i[s,p,p,p]
        cbeta = frow_ref[0, :, 4 * (I + 1):N]           # (1, 4*cnt) beta_j per column
        u_scr[4 * I:4 * I + 4, 4 * (I + 1):N] = slab * ((rbeta + cbeta) * scale)
        rs += cnt

    # Symmetrize + block-diagonal in one pass: H = triu(U) + triu(U,1)^T + diag(F).
    uf = u_scr[...]
    r = lax.broadcasted_iota(jnp.int32, (N, N), 0)
    c = lax.broadcasted_iota(jnp.int32, (N, N), 1)
    frow = frow_ref[0]                                  # (1, N) broadcasts over rows
    out_ref[0] = jnp.where(r < c, uf, jnp.where(r > c, uf.T, frow))


def build_h_pallas(dip, f_row, f_col, *, molsize, scale):
    nmol, _, npm4 = dip.shape
    N = 4 * molsize
    dtype = dip.dtype
    itemsize = jnp.dtype(dtype).itemsize
    # out (double-buffered) + dip (double-buffered) + scratch + transpose/select temps
    est = (5 * N * N + 8 * npm4 + 16 * N) * itemsize

    kern = functools.partial(_build_h_kernel, molsize=molsize, scale=float(scale))
    # TODO(synk): for very large molecules (N >~ 1400 on v7x's 64 MiB VMEM) or nmol==1 on
    # v7x (dual TensorCores), tile this kernel into 2-D block tiles instead of one full
    # (N, N) block per molecule.
    return pl.pallas_call(
        kern,
        out_shape=jax.ShapeDtypeStruct((nmol, N, N), dtype),
        grid_spec=pltpu.PrefetchScalarGridSpec(
            num_scalar_prefetch=0,
            grid=(nmol,),
            in_specs=[
                pl.BlockSpec((1, 4, npm4), lambda m: (m, 0, 0)),
                pl.BlockSpec((1, 1, N), lambda m: (m, 0, 0)),
                pl.BlockSpec((1, N, 1), lambda m: (m, 0, 0)),
            ],
            out_specs=pl.BlockSpec((1, N, N), lambda m: (m, 0, 0)),
            scratch_shapes=[pltpu.VMEM((N, N), dtype)],
        ),
        compiler_params=pltpu.CompilerParams(
            dimension_semantics=("parallel",),
            vmem_limit_bytes=_vmem_limit_bytes(est),
        ),
    )(dip, f_row, f_col)


# ----------------------------------------------------------------------------
# huckel(): matches the PyTorch reference semantics
# ----------------------------------------------------------------------------
def huckel(nmol, molsize, maskd, mask, idxi, idxj, di, rij, beta, Kstar=None):
    dtype = di.dtype
    N = 4 * molsize
    npm = molsize * (molsize - 1) // 2                  # pairs per molecule (triu)
    P = rij.shape[0]
    if P != nmol * npm:
        raise ValueError("huckel(): expected nmol * molsize*(molsize-1)/2 pairs")

    # The fused kernel relies on the canonical parser layout: pairs grouped by molecule
    # in triu row-major (I, J>I) order and atoms in molecule-major order.
    if isinstance(mask, np.ndarray) and isinstance(maskd, np.ndarray):
        iu, ju = np.triu_indices(molsize, k=1)
        exp_mask = (np.repeat(np.arange(nmol), iu.size) * molsize * molsize
                    + np.tile(iu, nmol) * molsize + np.tile(ju, nmol))
        exp_maskd = (np.arange(nmol)[:, None] * molsize * molsize
                     + np.arange(molsize)[None, :] * (molsize + 1)).reshape(-1)
        if not (np.array_equal(np.asarray(mask), exp_mask)
                and np.array_equal(np.asarray(maskd), exp_maskd)):
            raise ValueError("huckel(): pair/atom ordering must match the triu parser layout")

    # Fold cutoff gate (and per-pair Kstar) into the pair blocks and transpose once into
    # the lane-dense layout dip[m, a, 4*q + b] = gated_di[molecule m, pair q][a, b].
    gate = rij <= OVERLAP_CUTOFF
    if Kstar is None:
        g = gate.astype(dtype)
        scale = 0.5 * 1.75                              # default Kstar folded in
    else:
        g = jnp.where(gate, jnp.asarray(Kstar, dtype=dtype), jnp.zeros((), dtype))
        scale = 0.5
    di_eff = di.reshape(P, 4, 4) * g[:, None, None]
    dip = di_eff.reshape(nmol, npm, 4, 4).transpose(0, 2, 1, 3).reshape(nmol, 4, 4 * npm)

    # Per-orbital beta factor F[m, 4I+c] = beta[m, I, 0 if c==0 else 1]; both the pair
    # scaling (F_row + F_col)/2*K and the block-diagonal are expressed through F.
    beta3 = beta.reshape(nmol, molsize, 2).astype(dtype)
    F = jnp.concatenate(
        [beta3[:, :, 0:1], jnp.broadcast_to(beta3[:, :, 1:2], (nmol, molsize, 3))],
        axis=2).reshape(nmol, N)
    f_row = F.reshape(nmol, 1, N)
    f_col = F.reshape(nmol, N, 1)

    return build_h_pallas(dip, f_row, f_col, molsize=molsize, scale=scale)


# ----------------------------------------------------------------------------
# Synthetic parser (geometric preprocessing; PYSEQM Parser source not provided)
# ----------------------------------------------------------------------------
def simple_parser(coordinates, species):
    nmol, molsize, _ = coordinates.shape
    Z = np.asarray(species).reshape(-1)
    iu, ju = np.triu_indices(molsize, k=1)
    npair = iu.shape[0]
    mol = np.repeat(np.arange(nmol), npair)
    ii = np.tile(iu, nmol)
    jj = np.tile(ju, nmol)
    idxi = (mol * molsize + ii).astype(np.int32)                     # global atom index
    idxj = (mol * molsize + jj).astype(np.int32)
    mask = (mol * molsize * molsize + ii * molsize + jj).astype(np.int32)
    maskd = (np.arange(nmol)[:, None] * molsize * molsize
             + np.arange(molsize)[None, :] * (molsize + 1)).reshape(-1).astype(np.int32)
    flat = np.asarray(coordinates).reshape(-1, 3)
    rvec = flat[idxj] - flat[idxi]
    rij = jnp.asarray(np.linalg.norm(rvec, axis=1), dtype=jnp.float32)
    xij = jnp.asarray(rvec, dtype=jnp.float32) / rij[:, None]
    ni, nj = Z[idxi], Z[idxj]
    return nmol, molsize, Z, maskd, mask, idxi, idxj, ni, nj, xij, rij


# ----------------------------------------------------------------------------
# Huckel "module": deterministic parameter table + forward
# ----------------------------------------------------------------------------
class HuckelPallas:
    def __init__(self, elements=(1, 6, 7, 8)):
        zmax = max(elements)
        z = jnp.arange(zmax + 1, dtype=jnp.float32)
        # parameter rows: U_ss, U_pp, zeta_s, zeta_p (deterministic synthetic table)
        self.p = jnp.stack([-(5.0 + 2.0 * z),
                            -(3.0 + 1.5 * z),
                            0.8 + 0.1 * z,
                            0.7 + 0.1 * z])              # (4, zmax+1)

    def forward(self, coordinates, species, di, Kstar=None):
        (nmol, molsize, Z, maskd, mask, idxi, idxj,
         ni, nj, xij, rij) = simple_parser(coordinates, species)

        U_ss = self.p[0, Z]
        U_pp = self.p[1, Z]
        zeta_s = self.p[2, Z]   # noqa: F841  (consumed only by diatom_overlap_matrix)
        zeta_p = self.p[3, Z]   # noqa: F841
        beta = jnp.stack([U_ss, U_pp], axis=1)           # (natoms, 2)

        # TODO(synk): diatom_overlap_matrix (STO A/B overlap integrals) source not
        # provided; the pair overlap blocks `di` are taken as an external input.
        H = huckel(nmol, molsize, maskd, mask, idxi, idxj, di, rij, beta, Kstar)

        # TODO(synk): sym_eig_trunc1 (heavy/hydrogen orbital-count truncation) source not
        # provided; using a full symmetric eigendecomposition (eig_only path).
        e, v = jnp.linalg.eigh(H)
        return H, e, v


# ----------------------------------------------------------------------------
# Pure-JAX reference of the huckel() Hamiltonian for correctness checking
# ----------------------------------------------------------------------------
def _reference_H(nmol, molsize, maskd, mask, idxi, idxj, di, rij, beta, Kstar=None):
    dtype = di.dtype
    if Kstar is None:
        kfac = jnp.full((di.shape[0],), 1.75, dtype=dtype)
    else:
        kfac = jnp.asarray(Kstar, dtype=dtype)
    keep = (rij <= OVERLAP_CUTOFF)[:, None, None]
    sel = jnp.array([0, 1, 1, 1], dtype=jnp.int32)
    bi = beta[idxi][:, sel]                               # (P, 4) row factors
    bj = beta[idxj][:, sel]                               # (P, 4) col factors
    blocks = jnp.where(
        keep, di * (bi[:, :, None] + bj[:, None, :]) * 0.5 * kfac[:, None, None], 0.0)
    natoms = beta.shape[0]
    diag = jnp.zeros((natoms, 4, 4), dtype=dtype)
    diag = diag.at[:, 0, 0].set(beta[:, 0]).at[:, 1, 1].set(beta[:, 1])
    diag = diag.at[:, 2, 2].set(beta[:, 1]).at[:, 3, 3].set(beta[:, 1])
    M = jnp.zeros((nmol * molsize * molsize, 4, 4), dtype=dtype)
    M = M.at[maskd].set(diag).at[mask].set(blocks)
    H = M.reshape(nmol, molsize, molsize, 4, 4).transpose(0, 1, 3, 2, 4)
    H = H.reshape(nmol, 4 * molsize, 4 * molsize)
    return jnp.triu(H) + jnp.swapaxes(jnp.triu(H, 1), 1, 2)


if __name__ == "__main__":
    key = jax.random.PRNGKey(0)
    k1, k2, k3, k4 = jax.random.split(key, 4)

    nmol, molsize = 2, 32                                 # N = 4*molsize = 128
    coordinates = jax.random.uniform(k1, (nmol, molsize, 3),
                                     dtype=jnp.float32, minval=0.0, maxval=8.0)
    species = jax.random.choice(k2, jnp.array([1, 6, 7, 8], dtype=jnp.int32),
                                shape=(nmol, molsize))

    n_pairs = nmol * molsize * (molsize - 1) // 2         # 992
    di = 0.1 * jax.random.normal(k3, (n_pairs, 4, 4), dtype=jnp.float32)

    model = HuckelPallas()
    H, e, v = model.forward(coordinates, species, di)
    jax.block_until_ready((H, e, v))

    assert H.shape == (nmol, 4 * molsize, 4 * molsize)
    assert bool(jnp.allclose(H, jnp.swapaxes(H, 1, 2)))   # symmetric by construction

    # correctness vs. a plain-JAX translation of the reference huckel() (default Kstar)
    (nm, ms, Z, maskd, mask, idxi, idxj, ni, nj, xij, rij) = simple_parser(coordinates,
                                                                           species)
    beta = jnp.stack([model.p[0, Z], model.p[1, Z]], axis=1)
    H_ref = _reference_H(nm, ms, maskd, mask, idxi, idxj, di, rij, beta)
    assert bool(jnp.allclose(H, H_ref, rtol=1e-5, atol=1e-5))

    # tensor-Kstar path (previously untested per the review's correctness note)
    Kstar = 1.0 + 0.5 * jax.random.uniform(k4, (n_pairs,), dtype=jnp.float32)
    H_k = huckel(nm, ms, maskd, mask, idxi, idxj, di, rij, beta, Kstar=Kstar)
    H_k_ref = _reference_H(nm, ms, maskd, mask, idxi, idxj, di, rij, beta, Kstar=Kstar)
    jax.block_until_ready(H_k)
    assert bool(jnp.allclose(H_k, H_k_ref, rtol=1e-5, atol=1e-5))

    print("KERNEL_OK")
</pallas_src>

<mosaic_0001>
module attributes {stable_mosaic.version = 11 : i64} {
  func.func @_build_h_kernel(%arg0: i32, %arg1: memref<1x4x1984xf32, #tpu.memory_space<vmem>>, %arg2: memref<1x1x128xf32, #tpu.memory_space<vmem>>, %arg3: memref<1x128x1xf32, #tpu.memory_space<vmem>>, %arg4: memref<1x128x128xf32, #tpu.memory_space<vmem>>, %arg5: memref<128x128xf32, #tpu.memory_space<vmem>>) attributes {dimension_semantics = [#tpu.dimension_semantics<parallel>], iteration_bounds = array<i64: 2>, scalar_prefetch = 0 : i64, scratch_operands = 1 : i64, tpu.core_type = #tpu.core_type<tc>, window_params = [{transform_indices = @transform_0, window_bounds = array<i64: 1, 4, 1984>}, {transform_indices = @transform_1, window_bounds = array<i64: 1, 1, 128>}, {transform_indices = @transform_2, window_bounds = array<i64: 1, 128, 1>}, {transform_indices = @transform_3, window_bounds = array<i64: 1, 128, 128>}]} {
    %cst = arith.constant 0.000000e+00 : f32
    %0 = vector.broadcast %cst : f32 to vector<128x128xf32>
    %c0 = arith.constant 0 : index
    %c0_0 = arith.constant 0 : index
    %1 = vector.load %arg5[%c0, %c0_0] : memref<128x128xf32, #tpu.memory_space<vmem>>, vector<128x128xf32>
    tpu.vector_store %arg5[%c0, %c0_0], %0 {strides = array<i32>} : memref<128x128xf32, #tpu.memory_space<vmem>>, vector<128x128xf32>,
    %c0_1 = arith.constant 0 : index
    %c0_2 = arith.constant 0 : index
    %c0_3 = arith.constant 0 : index
    %2 = vector.load %arg1[%c0_1, %c0_2, %c0_3] : memref<1x4x1984xf32, #tpu.memory_space<vmem>>, vector<1x4x124xf32>
    %3 = vector.shape_cast %2 : vector<1x4x124xf32> to vector<4x124xf32>
    %c0_4 = arith.constant 0 : index
    %c0_5 = arith.constant 0 : index
    %c0_6 = arith.constant 0 : index
    %4 = vector.load %arg3[%c0_4, %c0_5, %c0_6] : memref<1x128x1xf32, #tpu.memory_space<vmem>>, vector<1x4x1xf32>
    %5 = vector.shape_cast %4 : vector<1x4x1xf32> to vector<4x1xf32>
    %c0_7 = arith.constant 0 : index
    %c0_8 = arith.constant 0 : index
    %c4 = arith.constant 4 : index
    %6 = vector.load %arg2[%c0_7, %c0_8, %c4] : memref<1x1x128xf32, #tpu.memory_space<vmem>>, vector<1x1x124xf32>
    %7 = vector.shape_cast %6 : vector<1x1x124xf32> to vector<1x124xf32>
    %8 = vector.broadcast %5 : vector<4x1xf32> to vector<4x124xf32>
    %9 = vector.broadcast %7 : vector<1x124xf32> to vector<4x124xf32>
    %10 = arith.addf %8, %9 : vector<4x124xf32>
    %cst_9 = arith.constant 8.750000e-01 : f32
    %11 = vector.broadcast %cst_9 : f32 to vector<4x124xf32>
    %12 = arith.mulf %10, %11 : vector<4x124xf32>
    %13 = arith.mulf %3, %12 : vector<4x124xf32>
    %c0_10 = arith.constant 0 : index
    %c4_11 = arith.constant 4 : index
    %14 = vector.load %arg5[%c0_10, %c4_11] : memref<128x128xf32, #tpu.memory_space<vmem>>, vector<4x124xf32>
    tpu.vector_store %arg5[%c0_10, %c4_11], %13 {strides = array<i32>} : memref<128x128xf32, #tpu.memory_space<vmem>>, vector<4x124xf32>,
    %c0_12 = arith.constant 0 : index
    %c0_13 = arith.constant 0 : index
    %c124 = arith.constant 124 : index
    %15 = vector.load %arg1[%c0_12, %c0_13, %c124] : memref<1x4x1984xf32, #tpu.memory_space<vmem>>, vector<1x4x120xf32>
    %16 = vector.shape_cast %15 : vector<1x4x120xf32> to vector<4x120xf32>
    %c0_14 = arith.constant 0 : index
    %c4_15 = arith.constant 4 : index
    %c0_16 = arith.constant 0 : index
    %17 = vector.load %arg3[%c0_14, %c4_15, %c0_16] : memref<1x128x1xf32, #tpu.memory_space<vmem>>, vector<1x4x1xf32>
    %18 = vector.shape_cast %17 : vector<1x4x1xf32> to vector<4x1xf32>
    %c0_17 = arith.constant 0 : index
    %c0_18 = arith.constant 0 : index
    %c8 = arith.constant 8 : index
    %19 = vector.load %arg2[%c0_17, %c0_18, %c8] : memref<1x1x128xf32, #tpu.memory_space<vmem>>, vector<1x1x120xf32>
    %20 = vector.shape_cast %19 : vector<1x1x120xf32> to vector<1x120xf32>
    %21 = vector.broadcast %18 : vector<4x1xf32> to vector<4x120xf32>
    %22 = vector.broadcast %20 : vector<1x120xf32> to vector<4x120xf32>
    %23 = arith.addf %21, %22 : vector<4x120xf32>
    %cst_19 = arith.constant 8.750000e-01 : f32
    %24 = vector.broadcast %cst_19 : f32 to vector<4x120xf32>
    %25 = arith.mulf %23, %24 : vector<4x120xf32>
    %26 = arith.mulf %16, %25 : vector<4x120xf32>
    %c4_20 = arith.constant 4 : index
    %c8_21 = arith.constant 8 : index
    %27 = vector.load %arg5[%c4_20, %c8_21] : memref<128x128xf32, #tpu.memory_space<vmem>>, vector<4x120xf32>
    tpu.vector_store %arg5[%c4_20, %c8_21], %26 {strides = array<i32>} : memref<128x128xf32, #tpu.memory_space<vmem>>, vector<4x120xf32>,
    %c0_22 = arith.constant 0 : index
    %c0_23 = arith.constant 0 : index
    %c244 = arith.constant 244 : index
    %28 = vector.load %arg1[%c0_22, %c0_23, %c244] : memref<1x4x1984xf32, #tpu.memory_space<vmem>>, vector<1x4x116xf32>
    %29 = vector.shape_cast %28 : vector<1x4x116xf32> to vector<4x116xf32>
    %c0_24 = arith.constant 0 : index
    %c8_25 = arith.constant 8 : index
    %c0_26 = arith.constant 0 : index
    %30 = vector.load %arg3[%c0_24, %c8_25, %c0_26] : memref<1x128x1xf32, #tpu.memory_space<vmem>>, vector<1x4x1xf32>
    %31 = vector.shape_cast %30 : vector<1x4x1xf32> to vector<4x1xf32>
    %c0_27 = arith.constant 0 : index
    %c0_28 = arith.constant 0 : index
    %c12 = arith.constant 12 : index
    %32 = vector.load %arg2[%c0_27, %c0_28, %c12] : memref<1x1x128xf32, #tpu.memory_space<vmem>>, vector<1x1x116xf32>
    %33 = vector.shape_cast %32 : vector<1x1x116xf32> to vector<1x116xf32>
    %34 = vector.broadcast %31 : vector<4x1xf32> to vector<4x116xf32>
    %35 = vector.broadcast %33 : vector<1x116xf32> to vector<4x116xf32>
    %36 = arith.addf %34, %35 : vector<4x116xf32>
    %cst_29 = arith.constant 8.750000e-01 : f32
    %37 = vector.broadcast %cst_29 : f32 to vector<4x116xf32>
    %38 = arith.mulf %36, %37 : vector<4x116xf32>
    %39 = arith.mulf %29, %38 : vector<4x116xf32>
    %c8_30 = arith.constant 8 : index
    %c12_31 = arith.constant 12 : index
    %40 = vector.load %arg5[%c8_30, %c12_31] : memref<128x128xf32, #tpu.memory_space<vmem>>, vector<4x116xf32>
    tpu.vector_store %arg5[%c8_30, %c12_31], %39 {strides = array<i32>} : memref<128x128xf32, #tpu.memory_space<vmem>>, vector<4x116xf32>,
    %c0_32 = arith.constant 0 : index
    %c0_33 = arith.constant 0 : index
    %c360 = arith.constant 360 : index
    %41 = vector.load %arg1[%c0_32, %c0_33, %c360] : memref<1x4x1984xf32, #tpu.memory_space<vmem>>, vector<1x4x112xf32>
    %42 = vector.shape_cast %41 : vector<1x4x112xf32> to vector<4x112xf32>
    %c0_34 = arith.constant 0 : index
    %c12_35 = arith.constant 12 : index
    %c0_36 = arith.constant 0 : index
    %43 = vector.load %arg3[%c0_34, %c12_35, %c0_36] : memref<1x128x1xf32, #tpu.memory_space<vmem>>, vector<1x4x1xf32>
    %44 = vector.shape_cast %43 : vector<1x4x1xf32> to vector<4x1xf32>
    %c0_37 = arith.constant 0 : index
    %c0_38 = arith.constant 0 : index
    %c16 = arith.constant 16 : index
    %45 = vector.load %arg2[%c0_37, %c0_38, %c16] : memref<1x1x128xf32, #tpu.memory_space<vmem>>, vector<1x1x112xf32>
    %46 = vector.shape_cast %45 : vector<1x1x112xf32> to vector<1x112xf32>
    %47 = vector.broadcast %44 : vector<4x1xf32> to vector<4x112xf32>
    %48 = vector.broadcast %46 : vector<1x112xf32> to vector<4x112xf32>
    %49 = arith.addf %47, %48 : vector<4x112xf32>
    %cst_39 = arith.constant 8.750000e-01 : f32
    %50 = vector.broadcast %cst_39 : f32 to vector<4x112xf32>
    %51 = arith.mulf %49, %50 : vector<4x112xf32>
    %52 = arith.mulf %42, %51 : vector<4x112xf32>
    %c12_40 = arith.constant 12 : index
    %c16_41 = arith.constant 16 : index
    %53 = vector.load %arg5[%c12_40, %c16_41] : memref<128x128xf32, #tpu.memory_space<vmem>>, vector<4x112xf32>
    tpu.vector_store %arg5[%c12_40, %c16_41], %52 {strides = array<i32>} : memref<128x128xf32, #tpu.memory_space<vmem>>, vector<4x112xf32>,
    %c0_42 = arith.constant 0 : index
    %c0_43 = arith.constant 0 : index
    %c472 = arith.constant 472 : index
    %54 = vector.load %arg1[%c0_42, %c0_43, %c472] : memref<1x4x1984xf32, #tpu.memory_space<vmem>>, vector<1x4x108xf32>
    %55 = vector.shape_cast %54 : vector<1x4x108xf32> to vector<4x108xf32>
    %c0_44 = arith.constant 0 : index
    %c16_45 = arith.constant 16 : index
    %c0_46 = arith.constant 0 : index
    %56 = vector.load %arg3[%c0_44, %c16_45, %c0_46] : memref<1x128x1xf32, #tpu.memory_space<vmem>>, vector<1x4x1xf32>
    %57 = vector.shape_cast %56 : vector<1x4x1xf32> to vector<4x1xf32>
    %c0_47 = arith.constant 0 : index
    %c0_48 = arith.constant 0 : index
    %c20 = arith.constant 20 : index
    %58 = vector.load %arg2[%c0_47, %c0_48, %c20] : memref<1x1x128xf32, #tpu.memory_space<vmem>>, vector<1x1x108xf32>
    %59 = vector.shape_cast %58 : vector<1x1x108xf32> to vector<1x108xf32>
    %60 = vector.broadcast %57 : vector<4x1xf32> to vector<4x108xf32>
    %61 = vector.broadcast %59 : vector<1x108xf32> to vector<4x108xf32>
    %62 = arith.addf %60, %61 : vector<4x108xf32>
    %cst_49 = arith.constant 8.750000e-01 : f32
    %63 = vector.broadcast %cst_49 : f32 to vector<4x108xf32>
    %64 = arith.mulf %62, %63 : vector<4x108xf32>
    %65 = arith.mulf %55, %64 : vector<4x108xf32>
    %c16_50 = arith.constant 16 : index
    %c20_51 = arith.constant 20 : index
    %66 = vector.load %arg5[%c16_50, %c20_51] : memref<128x128xf32, #tpu.memory_space<vmem>>, vector<4x108xf32>
    tpu.vector_store %arg5[%c16_50, %c20_51], %65 {strides = array<i32>} : memref<128x128xf32, #tpu.memory_space<vmem>>, vector<4x108xf32>,
    %c0_52 = arith.constant 0 : index
    %c0_53 = arith.constant 0 : index
    %c580 = arith.constant 580 : index
    %67 = vector.load %arg1[%c0_52, %c0_53, %c580] : memref<1x4x1984xf32, #tpu.memory_space<vmem>>, vector<1x4x104xf32>
    %68 = vector.shape_cast %67 : vector<1x4x104xf32> to vector<4x104xf32>
    %c0_54 = arith.constant 0 : index
    %c20_55 = arith.constant 20 : index
    %c0_56 = arith.constant 0 : index
    %69 = vector.load %arg3[%c0_54, %c20_55, %c0_56] : memref<1x128x1xf32, #tpu.memory_space<vmem>>, vector<1x4x1xf32>
    %70 = vector.shape_cast %69 : vector<1x4x1xf32> to vector<4x1xf32>
    %c0_57 = arith.constant 0 : index
    %c0_58 = arith.constant 0 : index
    %c24 = arith.constant 24 : index
    %71 = vector.load %arg2[%c0_57, %c0_58, %c24] : memref<1x1x128xf32, #tpu.memory_space<vmem>>, vector<1x1x104xf32>
    %72 = vector.shape_cast %71 : vector<1x1x104xf32> to vector<1x104xf32>
    %73 = vector.broadcast %70 : vector<4x1xf32> to vector<4x104xf32>
    %74 = vector.broadcast %72 : vector<1x104xf32> to vector<4x104xf32>
    %75 = arith.addf %73, %74 : vector<4x104xf32>
    %cst_59 = arith.constant 8.750000e-01 : f32
    %76 = vector.broadcast %cst_59 : f32 to vector<4x104xf32>
    %77 = arith.mulf %75, %76 : vector<4x104xf32>
    %78 = arith.mulf %68, %77 : vector<4x104xf32>
    %c20_60 = arith.constant 20 : index
    %c24_61 = arith.constant 24 : index
    %79 = vector.load %arg5[%c20_60, %c24_61] : memref<128x128xf32, #tpu.memory_space<vmem>>, vector<4x104xf32>
    tpu.vector_store %arg5[%c20_60, %c24_61], %78 {strides = array<i32>} : memref<128x128xf32, #tpu.memory_space<vmem>>, vector<4x104xf32>,
    %c0_62 = arith.constant 0 : index
    %c0_63 = arith.constant 0 : index
    %c684 = arith.constant 684 : index
    %80 = vector.load %arg1[%c0_62, %c0_63, %c684] : memref<1x4x1984xf32, #tpu.memory_space<vmem>>, vector<1x4x100xf32>
    %81 = vector.shape_cast %80 : vector<1x4x100xf32> to vector<4x100xf32>
    %c0_64 = arith.constant 0 : index
    %c24_65 = arith.constant 24 : index
    %c0_66 = arith.constant 0 : index
    %82 = vector.load %arg3[%c0_64, %c24_65, %c0_66] : memref<1x128x1xf32, #tpu.memory_space<vmem>>, vector<1x4x1xf32>
    %83 = vector.shape_cast %82 : vector<1x4x1xf32> to vector<4x1xf32>
    %c0_67 = arith.constant 0 : index
    %c0_68 = arith.constant 0 : index
    %c28 = arith.constant 28 : index
    %84 = vector.load %arg2[%c0_67, %c0_68, %c28] : memref<1x1x128xf32, #tpu.memory_space<vmem>>, vector<1x1x100xf32>
    %85 = vector.shape_cast %84 : vector<1x1x100xf32> to vector<1x100xf32>
    %86 = vector.broadcast %83 : vector<4x1xf32> to vector<4x100xf32>
    %87 = vector.broadcast %85 : vector<1x100xf32> to vector<4x100xf32>
    %88 = arith.addf %86, %87 : vector<4x100xf32>
    %cst_69 = arith.constant 8.750000e-01 : f32
    %89 = vector.broadcast %cst_69 : f32 to vector<4x100xf32>
    %90 = arith.mulf %88, %89 : vector<4x100xf32>
    %91 = arith.mulf %81, %90 : vector<4x100xf32>
    %c24_70 = arith.constant 24 : index
    %c28_71 = arith.constant 28 : index
    %92 = vector.load %arg5[%c24_70, %c28_71] : memref<128x128xf32, #tpu.memory_space<vmem>>, vector<4x100xf32>
    tpu.vector_store %arg5[%c24_70, %c28_71], %91 {strides = array<i32>} : memref<128x128xf32, #tpu.memory_space<vmem>>, vector<4x100xf32>,
    %c0_72 = arith.constant 0 : index
    %c0_73 = arith.constant 0 : index
    %c784 = arith.constant 784 : index
    %93 = vector.load %arg1[%c0_72, %c0_73, %c784] : memref<1x4x1984xf32, #tpu.memory_space<vmem>>, vector<1x4x96xf32>
    %94 = vector.shape_cast %93 : vector<1x4x96xf32> to vector<4x96xf32>
    %c0_74 = arith.constant 0 : index
    %c28_75 = arith.constant 28 : index
    %c0_76 = arith.constant 0 : index
    %95 = vector.load %arg3[%c0_74, %c28_75, %c0_76] : memref<1x128x1xf32, #tpu.memory_space<vmem>>, vector<1x4x1xf32>
    %96 = vector.shape_cast %95 : vector<1x4x1xf32> to vector<4x1xf32>
    %c0_77 = arith.constant 0 : index
    %c0_78 = arith.constant 0 : index
    %c32 = arith.constant 32 : index
    %97 = vector.load %arg2[%c0_77, %c0_78, %c32] : memref<1x1x128xf32, #tpu.memory_space<vmem>>, vector<1x1x96xf32>
    %98 = vector.shape_cast %97 : vector<1x1x96xf32> to vector<1x96xf32>
    %99 = vector.broadcast %96 : vector<4x1xf32> to vector<4x96xf32>
    %100 = vector.broadcast %98 : vector<1x96xf32> to vector<4x96xf32>
    %101 = arith.addf %99, %100 : vector<4x96xf32>
    %cst_79 = arith.constant 8.750000e-01 : f32
    %102 = vector.broadcast %cst_79 : f32 to vector<4x96xf32>
    %103 = arith.mulf %101, %102 : vector<4x96xf32>
    %104 = arith.mulf %94, %103 : vector<4x96xf32>
    %c28_80 = arith.constant 28 : index
    %c32_81 = arith.constant 32 : index
    %105 = vector.load %arg5[%c28_80, %c32_81] : memref<128x128xf32, #tpu.memory_space<vmem>>, vector<4x96xf32>
    tpu.vector_store %arg5[%c28_80, %c32_81], %104 {strides = array<i32>} : memref<128x128xf32, #tpu.memory_space<vmem>>, vector<4x96xf32>,
    %c0_82 = arith.constant 0 : index
    %c0_83 = arith.constant 0 : index
    %c880 = arith.constant 880 : index
    %106 = vector.load %arg1[%c0_82, %c0_83, %c880] : memref<1x4x1984xf32, #tpu.memory_space<vmem>>, vector<1x4x92xf32>
    %107 = vector.shape_cast %106 : vector<1x4x92xf32> to vector<4x92xf32>
    %c0_84 = arith.constant 0 : index
    %c32_85 = arith.constant 32 : index
    %c0_86 = arith.constant 0 : index
    %108 = vector.load %arg3[%c0_84, %c32_85, %c0_86] : memref<1x128x1xf32, #tpu.memory_space<vmem>>, vector<1x4x1xf32>
    %109 = vector.shape_cast %108 : vector<1x4x1xf32> to vector<4x1xf32>
    %c0_87 = arith.constant 0 : index
    %c0_88 = arith.constant 0 : index
    %c36 = arith.constant 36 : index
    %110 = vector.load %arg2[%c0_87, %c0_88, %c36] : memref<1x1x128xf32, #tpu.memory_space<vmem>>, vector<1x1x92xf32>
    %111 = vector.shape_cast %110 : vector<1x1x92xf32> to vector<1x92xf32>
    %112 = vector.broadcast %109 : vector<4x1xf32> to vector<4x92xf32>
    %113 = vector.broadcast %111 : vector<1x92xf32> to vector<4x92xf32>
    %114 = arith.addf %112, %113 : vector<4x92xf32>
    %cst_89 = arith.constant 8.750000e-01 : f32
    %115 = vector.broadcast %cst_89 : f32 to vector<4x92xf32>
    %116 = arith.mulf %114, %115 : vector<4x92xf32>
    %117 = arith.mulf %107, %116 : vector<4x92xf32>
    %c32_90 = arith.constant 32 : index
    %c36_91 = arith.constant 36 : index
    %118 = vector.load %arg5[%c32_90, %c36_91] : memref<128x128xf32, #tpu.memory_space<vmem>>, vector<4x92xf32>
    tpu.vector_store %arg5[%c32_90, %c36_91], %117 {strides = array<i32>} : memref<128x128xf32, #tpu.memory_space<vmem>>, vector<4x92xf32>,
    %c0_92 = arith.constant 0 : index
    %c0_93 = arith.constant 0 : index
    %c972 = arith.constant 972 : index
    %119 = vector.load %arg1[%c0_92, %c0_93, %c972] : memref<1x4x1984xf32, #tpu.memory_space<vmem>>, vector<1x4x88xf32>
    %120 = vector.shape_cast %119 : vector<1x4x88xf32> to vector<4x88xf32>
    %c0_94 = arith.constant 0 : index
    %c36_95 = arith.constant 36 : index
    %c0_96 = arith.constant 0 : index
    %121 = vector.load %arg3[%c0_94, %c36_95, %c0_96] : memref<1x128x1xf32, #tpu.memory_space<vmem>>, vector<1x4x1xf32>
    %122 = vector.shape_cast %121 : vector<1x4x1xf32> to vector<4x1xf32>
    %c0_97 = arith.constant 0 : index
    %c0_98 = arith.constant 0 : index
    %c40 = arith.constant 40 : index
    %123 = vector.load %arg2[%c0_97, %c0_98, %c40] : memref<1x1x128xf32, #tpu.memory_space<vmem>>, vector<1x1x88xf32>
    %124 = vector.shape_cast %123 : vector<1x1x88xf32> to vector<1x88xf32>
    %125 = vector.broadcast %122 : vector<4x1xf32> to vector<4x88xf32>
    %126 = vector.broadcast %124 : vector<1x88xf32> to vector<4x88xf32>
    %127 = arith.addf %125, %126 : vector<4x88xf32>
    %cst_99 = arith.constant 8.750000e-01 : f32
    %128 = vector.broadcast %cst_99 : f32 to vector<4x88xf32>
    %129 = arith.mulf %127, %128 : vector<4x88xf32>
    %130 = arith.mulf %120, %129 : vector<4x88xf32>
    %c36_100 = arith.constant 36 : index
    %c40_101 = arith.constant 40 : index
    %131 = vector.load %arg5[%c36_100, %c40_101] : memref<128x128xf32, #tpu.memory_space<vmem>>, vector<4x88xf32>
    tpu.vector_store %arg5[%c36_100, %c40_101], %130 {strides = array<i32>} : memref<128x128xf32, #tpu.memory_space<vmem>>, vector<4x88xf32>,
    %c0_102 = arith.constant 0 : index
    %c0_103 = arith.constant 0 : index
    %c1060 = arith.constant 1060 : index
    %132 = vector.load %arg1[%c0_102, %c0_103, %c1060] : memref<1x4x1984xf32, #tpu.memory_space<vmem>>, vector<1x4x84xf32>
    %133 = vector.shape_cast %132 : vector<1x4x84xf32> to vector<4x84xf32>
    %c0_104 = arith.constant 0 : index
    %c40_105 = arith.constant 40 : index
    %c0_106 = arith.constant 0 : index
    %134 = vector.load %arg3[%c0_104, %c40_105, %c0_106] : memref<1x128x1xf32, #tpu.memory_space<vmem>>, vector<1x4x1xf32>
    %135 = vector.shape_cast %134 : vector<1x4x1xf32> to vector<4x1xf32>
    %c0_107 = arith.constant 0 : index
    %c0_108 = arith.constant 0 : index
    %c44 = arith.constant 44 : index
    %136 = vector.load %arg2[%c0_107, %c0_108, %c44] : memref<1x1x128xf32, #tpu.memory_space<vmem>>, vector<1x1x84xf32>
    %137 = vector.shape_cast %136 : vector<1x1x84xf32> to vector<1x84xf32>
    %138 = vector.broadcast %135 : vector<4x1xf32> to vector<4x84xf32>
    %139 = vector.broadcast %137 : vector<1x84xf32> to vector<4x84xf32>
    %140 = arith.addf %138, %139 : vector<4x84xf32>
    %cst_109 = arith.constant 8.750000e-01 : f32
    %141 = vector.broadcast %cst_109 : f32 to vector<4x84xf32>
    %142 = arith.mulf %140, %141 : vector<4x84xf32>
    %143 = arith.mulf %133, %142 : vector<4x84xf32>
    %c40_110 = arith.constant 40 : index
    %c44_111 = arith.constant 44 : index
    %144 = vector.load %arg5[%c40_110, %c44_111] : memref<128x128xf32, #tpu.memory_space<vmem>>, vector<4x84xf32>
    tpu.vector_store %arg5[%c40_110, %c44_111], %143 {strides = array<i32>} : memref<128x128xf32, #tpu.memory_space<vmem>>, vector<4x84xf32>,
    %c0_112 = arith.constant 0 : index
    %c0_113 = arith.constant 0 : index
    %c1144 = arith.constant 1144 : index
    %145 = vector.load %arg1[%c0_112, %c0_113, %c1144] : memref<1x4x1984xf32, #tpu.memory_space<vmem>>, vector<1x4x80xf32>
    %146 = vector.shape_cast %145 : vector<1x4x80xf32> to vector<4x80xf32>
    %c0_114 = arith.constant 0 : index
    %c44_115 = arith.constant 44 : index
    %c0_116 = arith.constant 0 : index
    %147 = vector.load %arg3[%c0_114, %c44_115, %c0_116] : memref<1x128x1xf32, #tpu.memory_space<vmem>>, vector<1x4x1xf32>
    %148 = vector.shape_cast %147 : vector<1x4x1xf32> to vector<4x1xf32>
    %c0_117 = arith.constant 0 : index
    %c0_118 = arith.constant 0 : index
    %c48 = arith.constant 48 : index
    %149 = vector.load %arg2[%c0_117, %c0_118, %c48] : memref<1x1x128xf32, #tpu.memory_space<vmem>>, vector<1x1x80xf32>
    %150 = vector.shape_cast %149 : vector<1x1x80xf32> to vector<1x80xf32>
    %151 = vector.broadcast %148 : vector<4x1xf32> to vector<4x80xf32>
    %152 = vector.broadcast %150 : vector<1x80xf32> to vector<4x80xf32>
    %153 = arith.addf %151, %152 : vector<4x80xf32>
    %cst_119 = arith.constant 8.750000e-01 : f32
    %154 = vector.broadcast %cst_119 : f32 to vector<4x80xf32>
    %155 = arith.mulf %153, %154 : vector<4x80xf32>
    %156 = arith.mulf %146, %155 : vector<4x80xf32>
    %c44_120 = arith.constant 44 : index
    %c48_121 = arith.constant 48 : index
    %157 = vector.load %arg5[%c44_120, %c48_121] : memref<128x128xf32, #tpu.memory_space<vmem>>, vector<4x80xf32>
    tpu.vector_store %arg5[%c44_120, %c48_121], %156 {strides = array<i32>} : memref<128x128xf32, #tpu.memory_space<vmem>>, vector<4x80xf32>,
    %c0_122 = arith.constant 0 : index
    %c0_123 = arith.constant 0 : index
    %c1224 = arith.constant 1224 : index
    %158 = vector.load %arg1[%c0_122, %c0_123, %c1224] : memref<1x4x1984xf32, #tpu.memory_space<vmem>>, vector<1x4x76xf32>
    %159 = vector.shape_cast %158 : vector<1x4x76xf32> to vector<4x76xf32>
    %c0_124 = arith.constant 0 : index
    %c48_125 = arith.constant 48 : index
    %c0_126 = arith.constant 0 : index
    %160 = vector.load %arg3[%c0_124, %c48_125, %c0_126] : memref<1x128x1xf32, #tpu.memory_space<vmem>>, vector<1x4x1xf32>
    %161 = vector.shape_cast %160 : vector<1x4x1xf32> to vector<4x1xf32>
    %c0_127 = arith.constant 0 : index
    %c0_128 = arith.constant 0 : index
    %c52 = arith.constant 52 : index
    %162 = vector.load %arg2[%c0_127, %c0_128, %c52] : memref<1x1x128xf32, #tpu.memory_space<vmem>>, vector<1x1x76xf32>
    %163 = vector.shape_cast %162 : vector<1x1x76xf32> to vector<1x76xf32>
    %164 = vector.broadcast %161 : vector<4x1xf32> to vector<4x76xf32>
    %165 = vector.broadcast %163 : vector<1x76xf32> to vector<4x76xf32>
    %166 = arith.addf %164, %165 : vector<4x76xf32>
    %cst_129 = arith.constant 8.750000e-01 : f32
    %167 = vector.broadcast %cst_129 : f32 to vector<4x76xf32>
    %168 = arith.mulf %166, %167 : vector<4x76xf32>
    %169 = arith.mulf %159, %168 : vector<4x76xf32>
    %c48_130 = arith.constant 48 : index
    %c52_131 = arith.constant 52 : index
    %170 = vector.load %arg5[%c48_130, %c52_131] : memref<128x128xf32, #tpu.memory_space<vmem>>, vector<4x76xf32>
    tpu.vector_store %arg5[%c48_130, %c52_131], %169 {strides = array<i32>} : memref<128x128xf32, #tpu.memory_space<vmem>>, vector<4x76xf32>,
    %c0_132 = arith.constant 0 : index
    %c0_133 = arith.constant 0 : index
    %c1300 = arith.constant 1300 : index
    %171 = vector.load %arg1[%c0_132, %c0_133, %c1300] : memref<1x4x1984xf32, #tpu.memory_space<vmem>>, vector<1x4x72xf32>
    %172 = vector.shape_cast %171 : vector<1x4x72xf32> to vector<4x72xf32>
    %c0_134 = arith.constant 0 : index
    %c52_135 = arith.constant 52 : index
    %c0_136 = arith.constant 0 : index
    %173 = vector.load %arg3[%c0_134, %c52_135, %c0_136] : memref<1x128x1xf32, #tpu.memory_space<vmem>>, vector<1x4x1xf32>
    %174 = vector.shape_cast %173 : vector<1x4x1xf32> to vector<4x1xf32>
    %c0_137 = arith.constant 0 : index
    %c0_138 = arith.constant 0 : index
    %c56 = arith.constant 56 : index
    %175 = vector.load %arg2[%c0_137, %c0_138, %c56] : memref<1x1x128xf32, #tpu.memory_space<vmem>>, vector<1x1x72xf32>
    %176 = vector.shape_cast %175 : vector<1x1x72xf32> to vector<1x72xf32>
    %177 = vector.broadcast %174 : vector<4x1xf32> to vector<4x72xf32>
    %178 = vector.broadcast %176 : vector<1x72xf32> to vector<4x72xf32>
    %179 = arith.addf %177, %178 : vector<4x72xf32>
    %cst_139 = arith.constant 8.750000e-01 : f32
    %180 = vector.broadcast %cst_139 : f32 to vector<4x72xf32>
    %181 = arith.mulf %179, %180 : vector<4x72xf32>
    %182 = arith.mulf %172, %181 : vector<4x72xf32>
    %c52_140 = arith.constant 52 : index
    %c56_141 = arith.constant 56 : index
    %183 = vector.load %arg5[%c52_140, %c56_141] : memref<128x128xf32, #tpu.memory_space<vmem>>, vector<4x72xf32>
    tpu.vector_store %arg5[%c52_140, %c56_141], %182 {strides = array<i32>} : memref<128x128xf32, #tpu.memory_space<vmem>>, vector<4x72xf32>,
    %c0_142 = arith.constant 0 : index
    %c0_143 = arith.constant 0 : index
    %c1372 = arith.constant 1372 : index
    %184 = vector.load %arg1[%c0_142, %c0_143, %c1372] : memref<1x4x1984xf32, #tpu.memory_space<vmem>>, vector<1x4x68xf32>
    %185 = vector.shape_cast %184 : vector<1x4x68xf32> to vector<4x68xf32>
    %c0_144 = arith.constant 0 : index
    %c56_145 = arith.constant 56 : index
    %c0_146 = arith.constant 0 : index
    %186 = vector.load %arg3[%c0_144, %c56_145, %c0_146] : memref<1x128x1xf32, #tpu.memory_space<vmem>>, vector<1x4x1xf32>
    %187 = vector.shape_cast %186 : vector<1x4x1xf32> to vector<4x1xf32>
    %c0_147 = arith.constant 0 : index
    %c0_148 = arith.constant 0 : index
    %c60 = arith.constant 60 : index
    %188 = vector.load %arg2[%c0_147, %c0_148, %c60] : memref<1x1x128xf32, #tpu.memory_space<vmem>>, vector<1x1x68xf32>
    %189 = vector.shape_cast %188 : vector<1x1x68xf32> to vector<1x68xf32>
    %190 = vector.broadcast %187 : vector<4x1xf32> to vector<4x68xf32>
    %191 = vector.broadcast %189 : vector<1x68xf32> to vector<4x68xf32>
    %192 = arith.addf %190, %191 : vector<4x68xf32>
    %cst_149 = arith.constant 8.750000e-01 : f32
    %193 = vector.broadcast %cst_149 : f32 to vector<4x68xf32>
    %194 = arith.mulf %192, %193 : vector<4x68xf32>
    %195 = arith.mulf %185, %194 : vector<4x68xf32>
    %c56_150 = arith.constant 56 : index
    %c60_151 = arith.constant 60 : index
    %196 = vector.load %arg5[%c56_150, %c60_151] : memref<128x128xf32, #tpu.memory_space<vmem>>, vector<4x68xf32>
    tpu.vector_store %arg5[%c56_150, %c60_151], %195 {strides = array<i32>} : memref<128x128xf32, #tpu.memory_space<vmem>>, vector<4x68xf32>,
    %c0_152 = arith.constant 0 : index
    %c0_153 = arith.constant 0 : index
    %c1440 = arith.constant 1440 : index
    %197 = vector.load %arg1[%c0_152, %c0_153, %c1440] : memref<1x4x1984xf32, #tpu.memory_space<vmem>>, vector<1x4x64xf32>
    %198 = vector.shape_cast %197 : vector<1x4x64xf32> to vector<4x64xf32>
    %c0_154 = arith.constant 0 : index
    %c60_155 = arith.constant 60 : index
    %c0_156 = arith.constant 0 : index
    %199 = vector.load %arg3[%c0_154, %c60_155, %c0_156] : memref<1x128x1xf32, #tpu.memory_space<vmem>>, vector<1x4x1xf32>
    %200 = vector.shape_cast %199 : vector<1x4x1xf32> to vector<4x1xf32>
    %c0_157 = arith.constant 0 : index
    %c0_158 = arith.constant 0 : index
    %c64 = arith.constant 64 : index
    %201 = vector.load %arg2[%c0_157, %c0_158, %c64] : memref<1x1x128xf32, #tpu.memory_space<vmem>>, vector<1x1x64xf32>
    %202 = vector.shape_cast %201 : vector<1x1x64xf32> to vector<1x64xf32>
    %203 = vector.broadcast %200 : vector<4x1xf32> to vector<4x64xf32>
    %204 = vector.broadcast %202 : vector<1x64xf32> to vector<4x64xf32>
    %205 = arith.addf %203, %204 : vector<4x64xf32>
    %cst_159 = arith.constant 8.750000e-01 : f32
    %206 = vector.broadcast %cst_159 : f32 to vector<4x64xf32>
    %207 = arith.mulf %205, %206 : vector<4x64xf32>
    %208 = arith.mulf %198, %207 : vector<4x64xf32>
    %c60_160 = arith.constant 60 : index
    %c64_161 = arith.constant 64 : index
    %209 = vector.load %arg5[%c60_160, %c64_161] : memref<128x128xf32, #tpu.memory_space<vmem>>, vector<4x64xf32>
    tpu.vector_store %arg5[%c60_160, %c64_161], %208 {strides = array<i32>} : memref<128x128xf32, #tpu.memory_space<vmem>>, vector<4x64xf32>,
    %c0_162 = arith.constant 0 : index
    %c0_163 = arith.constant 0 : index
    %c1504 = arith.constant 1504 : index
    %210 = vector.load %arg1[%c0_162, %c0_163, %c1504] : memref<1x4x1984xf32, #tpu.memory_space<vmem>>, vector<1x4x60xf32>
    %211 = vector.shape_cast %210 : vector<1x4x60xf32> to vector<4x60xf32>
    %c0_164 = arith.constant 0 : index
    %c64_165 = arith.constant 64 : index
    %c0_166 = arith.constant 0 : index
    %212 = vector.load %arg3[%c0_164, %c64_165, %c0_166] : memref<1x128x1xf32, #tpu.memory_space<vmem>>, vector<1x4x1xf32>
    %213 = vector.shape_cast %212 : vector<1x4x1xf32> to vector<4x1xf32>
    %c0_167 = arith.constant 0 : index
    %c0_168 = arith.constant 0 : index
    %c68 = arith.constant 68 : index
    %214 = vector.load %arg2[%c0_167, %c0_168, %c68] : memref<1x1x128xf32, #tpu.memory_space<vmem>>, vector<1x1x60xf32>
    %215 = vector.shape_cast %214 : vector<1x1x60xf32> to vector<1x60xf32>
    %216 = vector.broadcast %213 : vector<4x1xf32> to vector<4x60xf32>
    %217 = vector.broadcast %215 : vector<1x60xf32> to vector<4x60xf32>
    %218 = arith.addf %216, %217 : vector<4x60xf32>
    %cst_169 = arith.constant 8.750000e-01 : f32
    %219 = vector.broadcast %cst_169 : f32 to vector<4x60xf32>
    %220 = arith.mulf %218, %219 : vector<4x60xf32>
    %221 = arith.mulf %211, %220 : vector<4x60xf32>
    %c64_170 = arith.constant 64 : index
    %c68_171 = arith.constant 68 : index
    %222 = vector.load %arg5[%c64_170, %c68_171] : memref<128x128xf32, #tpu.memory_space<vmem>>, vector<4x60xf32>
    tpu.vector_store %arg5[%c64_170, %c68_171], %221 {strides = array<i32>} : memref<128x128xf32, #tpu.memory_space<vmem>>, vector<4x60xf32>,
    %c0_172 = arith.constant 0 : index
    %c0_173 = arith.constant 0 : index
    %c1564 = arith.constant 1564 : index
    %223 = vector.load %arg1[%c0_172, %c0_173, %c1564] : memref<1x4x1984xf32, #tpu.memory_space<vmem>>, vector<1x4x56xf32>
    %224 = vector.shape_cast %223 : vector<1x4x56xf32> to vector<4x56xf32>
    %c0_174 = arith.constant 0 : index
    %c68_175 = arith.constant 68 : index
    %c0_176 = arith.constant 0 : index
    %225 = vector.load %arg3[%c0_174, %c68_175, %c0_176] : memref<1x128x1xf32, #tpu.memory_space<vmem>>, vector<1x4x1xf32>
    %226 = vector.shape_cast %225 : vector<1x4x1xf32> to vector<4x1xf32>
    %c0_177 = arith.constant 0 : index
    %c0_178 = arith.constant 0 : index
    %c72 = arith.constant 72 : index
    %227 = vector.load %arg2[%c0_177, %c0_178, %c72] : memref<1x1x128xf32, #tpu.memory_space<vmem>>, vector<1x1x56xf32>
    %228 = vector.shape_cast %227 : vector<1x1x56xf32> to vector<1x56xf32>
    %229 = vector.broadcast %226 : vector<4x1xf32> to vector<4x56xf32>
    %230 = vector.broadcast %228 : vector<1x56xf32> to vector<4x56xf32>
    %231 = arith.addf %229, %230 : vector<4x56xf32>
    %cst_179 = arith.constant 8.750000e-01 : f32
    %232 = vector.broadcast %cst_179 : f32 to vector<4x56xf32>
    %233 = arith.mulf %231, %232 : vector<4x56xf32>
    %234 = arith.mulf %224, %233 : vector<4x56xf32>
    %c68_180 = arith.constant 68 : index
    %c72_181 = arith.constant 72 : index
    %235 = vector.load %arg5[%c68_180, %c72_181] : memref<128x128xf32, #tpu.memory_space<vmem>>, vector<4x56xf32>
    tpu.vector_store %arg5[%c68_180, %c72_181], %234 {strides = array<i32>} : memref<128x128xf32, #tpu.memory_space<vmem>>, vector<4x56xf32>,
    %c0_182 = arith.constant 0 : index
    %c0_183 = arith.constant 0 : index
    %c1620 = arith.constant 1620 : index
    %236 = vector.load %arg1[%c0_182, %c0_183, %c1620] : memref<1x4x1984xf32, #tpu.memory_space<vmem>>, vector<1x4x52xf32>
    %237 = vector.shape_cast %236 : vector<1x4x52xf32> to vector<4x52xf32>
    %c0_184 = arith.constant 0 : index
    %c72_185 = arith.constant 72 : index
    %c0_186 = arith.constant 0 : index
    %238 = vector.load %arg3[%c0_184, %c72_185, %c0_186] : memref<1x128x1xf32, #tpu.memory_space<vmem>>, vector<1x4x1xf32>
    %239 = vector.shape_cast %238 : vector<1x4x1xf32> to vector<4x1xf32>
    %c0_187 = arith.constant 0 : index
    %c0_188 = arith.constant 0 : index
    %c76 = arith.constant 76 : index
    %240 = vector.load %arg2[%c0_187, %c0_188, %c76] : memref<1x1x128xf32, #tpu.memory_space<vmem>>, vector<1x1x52xf32>
    %241 = vector.shape_cast %240 : vector<1x1x52xf32> to vector<1x52xf32>
    %242 = vector.broadcast %239 : vector<4x1xf32> to vector<4x52xf32>
    %243 = vector.broadcast %241 : vector<1x52xf32> to vector<4x52xf32>
    %244 = arith.addf %242, %243 : vector<4x52xf32>
    %cst_189 = arith.constant 8.750000e-01 : f32
    %245 = vector.broadcast %cst_189 : f32 to vector<4x52xf32>
    %246 = arith.mulf %244, %245 : vector<4x52xf32>
    %247 = arith.mulf %237, %246 : vector<4x52xf32>
    %c72_190 = arith.constant 72 : index
    %c76_191 = arith.constant 76 : index
    %248 = vector.load %arg5[%c72_190, %c76_191] : memref<128x128xf32, #tpu.memory_space<vmem>>, vector<4x52xf32>
    tpu.vector_store %arg5[%c72_190, %c76_191], %247 {strides = array<i32>} : memref<128x128xf32, #tpu.memory_space<vmem>>, vector<4x52xf32>,
    %c0_192 = arith.constant 0 : index
    %c0_193 = arith.constant 0 : index
    %c1672 = arith.constant 1672 : index
    %249 = vector.load %arg1[%c0_192, %c0_193, %c1672] : memref<1x4x1984xf32, #tpu.memory_space<vmem>>, vector<1x4x48xf32>
    %250 = vector.shape_cast %249 : vector<1x4x48xf32> to vector<4x48xf32>
    %c0_194 = arith.constant 0 : index
    %c76_195 = arith.constant 76 : index
    %c0_196 = arith.constant 0 : index
    %251 = vector.load %arg3[%c0_194, %c76_195, %c0_196] : memref<1x128x1xf32, #tpu.memory_space<vmem>>, vector<1x4x1xf32>
    %252 = vector.shape_cast %251 : vector<1x4x1xf32> to vector<4x1xf32>
    %c0_197 = arith.constant 0 : index
    %c0_198 = arith.constant 0 : index
    %c80 = arith.constant 80 : index
    %253 = vector.load %arg2[%c0_197, %c0_198, %c80] : memref<1x1x128xf32, #tpu.memory_space<vmem>>, vector<1x1x48xf32>
    %254 = vector.shape_cast %253 : vector<1x1x48xf32> to vector<1x48xf32>
    %255 = vector.broadcast %252 : vector<4x1xf32> to vector<4x48xf32>
    %256 = vector.broadcast %254 : vector<1x48xf32> to vector<4x48xf32>
    %257 = arith.addf %255, %256 : vector<4x48xf32>
    %cst_199 = arith.constant 8.750000e-01 : f32
    %258 = vector.broadcast %cst_199 : f32 to vector<4x48xf32>
    %259 = arith.mulf %257, %258 : vector<4x48xf32>
    %260 = arith.mulf %250, %259 : vector<4x48xf32>
    %c76_200 = arith.constant 76 : index
    %c80_201 = arith.constant 80 : index
    %261 = vector.load %arg5[%c76_200, %c80_201] : memref<128x128xf32, #tpu.memory_space<vmem>>, vector<4x48xf32>
    tpu.vector_store %arg5[%c76_200, %c80_201], %260 {strides = array<i32>} : memref<128x128xf32, #tpu.memory_space<vmem>>, vector<4x48xf32>,
    %c0_202 = arith.constant 0 : index
    %c0_203 = arith.constant 0 : index
    %c1720 = arith.constant 1720 : index
    %262 = vector.load %arg1[%c0_202, %c0_203, %c1720] : memref<1x4x1984xf32, #tpu.memory_space<vmem>>, vector<1x4x44xf32>
    %263 = vector.shape_cast %262 : vector<1x4x44xf32> to vector<4x44xf32>
    %c0_204 = arith.constant 0 : index
    %c80_205 = arith.constant 80 : index
    %c0_206 = arith.constant 0 : index
    %264 = vector.load %arg3[%c0_204, %c80_205, %c0_206] : memref<1x128x1xf32, #tpu.memory_space<vmem>>, vector<1x4x1xf32>
    %265 = vector.shape_cast %264 : vector<1x4x1xf32> to vector<4x1xf32>
    %c0_207 = arith.constant 0 : index
    %c0_208 = arith.constant 0 : index
    %c84 = arith.constant 84 : index
    %266 = vector.load %arg2[%c0_207, %c0_208, %c84] : memref<1x1x128xf32, #tpu.memory_space<vmem>>, vector<1x1x44xf32>
    %267 = vector.shape_cast %266 : vector<1x1x44xf32> to vector<1x44xf32>
    %268 = vector.broadcast %265 : vector<4x1xf32> to vector<4x44xf32>
    %269 = vector.broadcast %267 : vector<1x44xf32> to vector<4x44xf32>
    %270 = arith.addf %268, %269 : vector<4x44xf32>
    %cst_209 = arith.constant 8.750000e-01 : f32
    %271 = vector.broadcast %cst_209 : f32 to vector<4x44xf32>
    %272 = arith.mulf %270, %271 : vector<4x44xf32>
    %273 = arith.mulf %263, %272 : vector<4x44xf32>
    %c80_210 = arith.constant 80 : index
    %c84_211 = arith.constant 84 : index
    %274 = vector.load %arg5[%c80_210, %c84_211] : memref<128x128xf32, #tpu.memory_space<vmem>>, vector<4x44xf32>
    tpu.vector_store %arg5[%c80_210, %c84_211], %273 {strides = array<i32>} : memref<128x128xf32, #tpu.memory_space<vmem>>, vector<4x44xf32>,
    %c0_212 = arith.constant 0 : index
    %c0_213 = arith.constant 0 : index
    %c1764 = arith.constant 1764 : index
    %275 = vector.load %arg1[%c0_212, %c0_213, %c1764] : memref<1x4x1984xf32, #tpu.memory_space<vmem>>, vector<1x4x40xf32>
    %276 = vector.shape_cast %275 : vector<1x4x40xf32> to vector<4x40xf32>
    %c0_214 = arith.constant 0 : index
    %c84_215 = arith.constant 84 : index
    %c0_216 = arith.constant 0 : index
    %277 = vector.load %arg3[%c0_214, %c84_215, %c0_216] : memref<1x128x1xf32, #tpu.memory_space<vmem>>, vector<1x4x1xf32>
    %278 = vector.shape_cast %277 : vector<1x4x1xf32> to vector<4x1xf32>
    %c0_217 = arith.constant 0 : index
    %c0_218 = arith.constant 0 : index
    %c88 = arith.constant 88 : index
    %279 = vector.load %arg2[%c0_217, %c0_218, %c88] : memref<1x1x128xf32, #tpu.memory_space<vmem>>, vector<1x1x40xf32>
    %280 = vector.shape_cast %279 : vector<1x1x40xf32> to vector<1x40xf32>
    %281 = vector.broadcast %278 : vector<4x1xf32> to vector<4x40xf32>
    %282 = vector.broadcast %280 : vector<1x40xf32> to vector<4x40xf32>
    %283 = arith.addf %281, %282 : vector<4x40xf32>
    %cst_219 = arith.constant 8.750000e-01 : f32
    %284 = vector.broadcast %cst_219 : f32 to vector<4x40xf32>
    %285 = arith.mulf %283, %284 : vector<4x40xf32>
    %286 = arith.mulf %276, %285 : vector<4x40xf32>
    %c84_220 = arith.constant 84 : index
    %c88_221 = arith.constant 88 : index
    %287 = vector.load %arg5[%c84_220, %c88_221] : memref<128x128xf32, #tpu.memory_space<vmem>>, vector<4x40xf32>
    tpu.vector_store %arg5[%c84_220, %c88_221], %286 {strides = array<i32>} : memref<128x128xf32, #tpu.memory_space<vmem>>, vector<4x40xf32>,
    %c0_222 = arith.constant 0 : index
    %c0_223 = arith.constant 0 : index
    %c1804 = arith.constant 1804 : index
    %288 = vector.load %arg1[%c0_222, %c0_223, %c1804] : memref<1x4x1984xf32, #tpu.memory_space<vmem>>, vector<1x4x36xf32>
    %289 = vector.shape_cast %288 : vector<1x4x36xf32> to vector<4x36xf32>
    %c0_224 = arith.constant 0 : index
    %c88_225 = arith.constant 88 : index
    %c0_226 = arith.constant 0 : index
    %290 = vector.load %arg3[%c0_224, %c88_225, %c0_226] : memref<1x128x1xf32, #tpu.memory_space<vmem>>, vector<1x4x1xf32>
    %291 = vector.shape_cast %290 : vector<1x4x1xf32> to vector<4x1xf32>
    %c0_227 = arith.constant 0 : index
    %c0_228 = arith.constant 0 : index
    %c92 = arith.constant 92 : index
    %292 = vector.load %arg2[%c0_227, %c0_228, %c92] : memref<1x1x128xf32, #tpu.memory_space<vmem>>, vector<1x1x36xf32>
    %293 = vector.shape_cast %292 : vector<1x1x36xf32> to vector<1x36xf32>
    %294 = vector.broadcast %291 : vector<4x1xf32> to vector<4x36xf32>
    %295 = vector.broadcast %293 : vector<1x36xf32> to vector<4x36xf32>
    %296 = arith.addf %294, %295 : vector<4x36xf32>
    %cst_229 = arith.constant 8.750000e-01 : f32
    %297 = vector.broadcast %cst_229 : f32 to vector<4x36xf32>
    %298 = arith.mulf %296, %297 : vector<4x36xf32>
    %299 = arith.mulf %289, %298 : vector<4x36xf32>
    %c88_230 = arith.constant 88 : index
    %c92_231 = arith.constant 92 : index
    %300 = vector.load %arg5[%c88_230, %c92_231] : memref<128x128xf32, #tpu.memory_space<vmem>>, vector<4x36xf32>
    tpu.vector_store %arg5[%c88_230, %c92_231], %299 {strides = array<i32>} : memref<128x128xf32, #tpu.memory_space<vmem>>, vector<4x36xf32>,
    %c0_232 = arith.constant 0 : index
    %c0_233 = arith.constant 0 : index
    %c1840 = arith.constant 1840 : index
    %301 = vector.load %arg1[%c0_232, %c0_233, %c1840] : memref<1x4x1984xf32, #tpu.memory_space<vmem>>, vector<1x4x32xf32>
    %302 = vector.shape_cast %301 : vector<1x4x32xf32> to vector<4x32xf32>
    %c0_234 = arith.constant 0 : index
    %c92_235 = arith.constant 92 : index
    %c0_236 = arith.constant 0 : index
    %303 = vector.load %arg3[%c0_234, %c92_235, %c0_236] : memref<1x128x1xf32, #tpu.memory_space<vmem>>, vector<1x4x1xf32>
    %304 = vector.shape_cast %303 : vector<1x4x1xf32> to vector<4x1xf32>
    %c0_237 = arith.constant 0 : index
    %c0_238 = arith.constant 0 : index
    %c96 = arith.constant 96 : index
    %305 = vector.load %arg2[%c0_237, %c0_238, %c96] : memref<1x1x128xf32, #tpu.memory_space<vmem>>, vector<1x1x32xf32>
    %306 = vector.shape_cast %305 : vector<1x1x32xf32> to vector<1x32xf32>
    %307 = vector.broadcast %304 : vector<4x1xf32> to vector<4x32xf32>
    %308 = vector.broadcast %306 : vector<1x32xf32> to vector<4x32xf32>
    %309 = arith.addf %307, %308 : vector<4x32xf32>
    %cst_239 = arith.constant 8.750000e-01 : f32
    %310 = vector.broadcast %cst_239 : f32 to vector<4x32xf32>
    %311 = arith.mulf %309, %310 : vector<4x32xf32>
    %312 = arith.mulf %302, %311 : vector<4x32xf32>
    %c92_240 = arith.constant 92 : index
    %c96_241 = arith.constant 96 : index
    %313 = vector.load %arg5[%c92_240, %c96_241] : memref<128x128xf32, #tpu.memory_space<vmem>>, vector<4x32xf32>
    tpu.vector_store %arg5[%c92_240, %c96_241], %312 {strides = array<i32>} : memref<128x128xf32, #tpu.memory_space<vmem>>, vector<4x32xf32>,
    %c0_242 = arith.constant 0 : index
    %c0_243 = arith.constant 0 : index
    %c1872 = arith.constant 1872 : index
    %314 = vector.load %arg1[%c0_242, %c0_243, %c1872] : memref<1x4x1984xf32, #tpu.memory_space<vmem>>, vector<1x4x28xf32>
    %315 = vector.shape_cast %314 : vector<1x4x28xf32> to vector<4x28xf32>
    %c0_244 = arith.constant 0 : index
    %c96_245 = arith.constant 96 : index
    %c0_246 = arith.constant 0 : index
    %316 = vector.load %arg3[%c0_244, %c96_245, %c0_246] : memref<1x128x1xf32, #tpu.memory_space<vmem>>, vector<1x4x1xf32>
    %317 = vector.shape_cast %316 : vector<1x4x1xf32> to vector<4x1xf32>
    %c0_247 = arith.constant 0 : index
    %c0_248 = arith.constant 0 : index
    %c100 = arith.constant 100 : index
    %318 = vector.load %arg2[%c0_247, %c0_248, %c100] : memref<1x1x128xf32, #tpu.memory_space<vmem>>, vector<1x1x28xf32>
    %319 = vector.shape_cast %318 : vector<1x1x28xf32> to vector<1x28xf32>
    %320 = vector.broadcast %317 : vector<4x1xf32> to vector<4x28xf32>
    %321 = vector.broadcast %319 : vector<1x28xf32> to vector<4x28xf32>
    %322 = arith.addf %320, %321 : vector<4x28xf32>
    %cst_249 = arith.constant 8.750000e-01 : f32
    %323 = vector.broadcast %cst_249 : f32 to vector<4x28xf32>
    %324 = arith.mulf %322, %323 : vector<4x28xf32>
    %325 = arith.mulf %315, %324 : vector<4x28xf32>
    %c96_250 = arith.constant 96 : index
    %c100_251 = arith.constant 100 : index
    %326 = vector.load %arg5[%c96_250, %c100_251] : memref<128x128xf32, #tpu.memory_space<vmem>>, vector<4x28xf32>
    tpu.vector_store %arg5[%c96_250, %c100_251], %325 {strides = array<i32>} : memref<128x128xf32, #tpu.memory_space<vmem>>, vector<4x28xf32>,
    %c0_252 = arith.constant 0 : index
    %c0_253 = arith.constant 0 : index
    %c1900 = arith.constant 1900 : index
    %327 = vector.load %arg1[%c0_252, %c0_253, %c1900] : memref<1x4x1984xf32, #tpu.memory_space<vmem>>, vector<1x4x24xf32>
    %328 = vector.shape_cast %327 : vector<1x4x24xf32> to vector<4x24xf32>
    %c0_254 = arith.constant 0 : index
    %c100_255 = arith.constant 100 : index
    %c0_256 = arith.constant 0 : index
    %329 = vector.load %arg3[%c0_254, %c100_255, %c0_256] : memref<1x128x1xf32, #tpu.memory_space<vmem>>, vector<1x4x1xf32>
    %330 = vector.shape_cast %329 : vector<1x4x1xf32> to vector<4x1xf32>
    %c0_257 = arith.constant 0 : index
    %c0_258 = arith.constant 0 : index
    %c104 = arith.constant 104 : index
    %331 = vector.load %arg2[%c0_257, %c0_258, %c104] : memref<1x1x128xf32, #tpu.memory_space<vmem>>, vector<1x1x24xf32>
    %332 = vector.shape_cast %331 : vector<1x1x24xf32> to vector<1x24xf32>
    %333 = vector.broadcast %330 : vector<4x1xf32> to vector<4x24xf32>
    %334 = vector.broadcast %332 : vector<1x24xf32> to vector<4x24xf32>
    %335 = arith.addf %333, %334 : vector<4x24xf32>
    %cst_259 = arith.constant 8.750000e-01 : f32
    %336 = vector.broadcast %cst_259 : f32 to vector<4x24xf32>
    %337 = arith.mulf %335, %336 : vector<4x24xf32>
    %338 = arith.mulf %328, %337 : vector<4x24xf32>
    %c100_260 = arith.constant 100 : index
    %c104_261 = arith.constant 104 : index
    %339 = vector.load %arg5[%c100_260, %c104_261] : memref<128x128xf32, #tpu.memory_space<vmem>>, vector<4x24xf32>
    tpu.vector_store %arg5[%c100_260, %c104_261], %338 {strides = array<i32>} : memref<128x128xf32, #tpu.memory_space<vmem>>, vector<4x24xf32>,
    %c0_262 = arith.constant 0 : index
    %c0_263 = arith.constant 0 : index
    %c1924 = arith.constant 1924 : index
    %340 = vector.load %arg1[%c0_262, %c0_263, %c1924] : memref<1x4x1984xf32, #tpu.memory_space<vmem>>, vector<1x4x20xf32>
    %341 = vector.shape_cast %340 : vector<1x4x20xf32> to vector<4x20xf32>
    %c0_264 = arith.constant 0 : index
    %c104_265 = arith.constant 104 : index
    %c0_266 = arith.constant 0 : index
    %342 = vector.load %arg3[%c0_264, %c104_265, %c0_266] : memref<1x128x1xf32, #tpu.memory_space<vmem>>, vector<1x4x1xf32>
    %343 = vector.shape_cast %342 : vector<1x4x1xf32> to vector<4x1xf32>
    %c0_267 = arith.constant 0 : index
    %c0_268 = arith.constant 0 : index
    %c108 = arith.constant 108 : index
    %344 = vector.load %arg2[%c0_267, %c0_268, %c108] : memref<1x1x128xf32, #tpu.memory_space<vmem>>, vector<1x1x20xf32>
    %345 = vector.shape_cast %344 : vector<1x1x20xf32> to vector<1x20xf32>
    %346 = vector.broadcast %343 : vector<4x1xf32> to vector<4x20xf32>
    %347 = vector.broadcast %345 : vector<1x20xf32> to vector<4x20xf32>
    %348 = arith.addf %346, %347 : vector<4x20xf32>
    %cst_269 = arith.constant 8.750000e-01 : f32
    %349 = vector.broadcast %cst_269 : f32 to vector<4x20xf32>
    %350 = arith.mulf %348, %349 : vector<4x20xf32>
    %351 = arith.mulf %341, %350 : vector<4x20xf32>
    %c104_270 = arith.constant 104 : index
    %c108_271 = arith.constant 108 : index
    %352 = vector.load %arg5[%c104_270, %c108_271] : memref<128x128xf32, #tpu.memory_space<vmem>>, vector<4x20xf32>
    tpu.vector_store %arg5[%c104_270, %c108_271], %351 {strides = array<i32>} : memref<128x128xf32, #tpu.memory_space<vmem>>, vector<4x20xf32>,
    %c0_272 = arith.constant 0 : index
    %c0_273 = arith.constant 0 : index
    %c1944 = arith.constant 1944 : index
    %353 = vector.load %arg1[%c0_272, %c0_273, %c1944] : memref<1x4x1984xf32, #tpu.memory_space<vmem>>, vector<1x4x16xf32>
    %354 = vector.shape_cast %353 : vector<1x4x16xf32> to vector<4x16xf32>
    %c0_274 = arith.constant 0 : index
    %c108_275 = arith.constant 108 : index
    %c0_276 = arith.constant 0 : index
    %355 = vector.load %arg3[%c0_274, %c108_275, %c0_276] : memref<1x128x1xf32, #tpu.memory_space<vmem>>, vector<1x4x1xf32>
    %356 = vector.shape_cast %355 : vector<1x4x1xf32> to vector<4x1xf32>
    %c0_277 = arith.constant 0 : index
    %c0_278 = arith.constant 0 : index
    %c112 = arith.constant 112 : index
    %357 = vector.load %arg2[%c0_277, %c0_278, %c112] : memref<1x1x128xf32, #tpu.memory_space<vmem>>, vector<1x1x16xf32>
    %358 = vector.shape_cast %357 : vector<1x1x16xf32> to vector<1x16xf32>
    %359 = vector.broadcast %356 : vector<4x1xf32> to vector<4x16xf32>
    %360 = vector.broadcast %358 : vector<1x16xf32> to vector<4x16xf32>
    %361 = arith.addf %359, %360 : vector<4x16xf32>
    %cst_279 = arith.constant 8.750000e-01 : f32
    %362 = vector.broadcast %cst_279 : f32 to vector<4x16xf32>
    %363 = arith.mulf %361, %362 : vector<4x16xf32>
    %364 = arith.mulf %354, %363 : vector<4x16xf32>
    %c108_280 = arith.constant 108 : index
    %c112_281 = arith.constant 112 : index
    %365 = vector.load %arg5[%c108_280, %c112_281] : memref<128x128xf32, #tpu.memory_space<vmem>>, vector<4x16xf32>
    tpu.vector_store %arg5[%c108_280, %c112_281], %364 {strides = array<i32>} : memref<128x128xf32, #tpu.memory_space<vmem>>, vector<4x16xf32>,
    %c0_282 = arith.constant 0 : index
    %c0_283 = arith.constant 0 : index
    %c1960 = arith.constant 1960 : index
    %366 = vector.load %arg1[%c0_282, %c0_283, %c1960] : memref<1x4x1984xf32, #tpu.memory_space<vmem>>, vector<1x4x12xf32>
    %367 = vector.shape_cast %366 : vector<1x4x12xf32> to vector<4x12xf32>
    %c0_284 = arith.constant 0 : index
    %c112_285 = arith.constant 112 : index
    %c0_286 = arith.constant 0 : index
    %368 = vector.load %arg3[%c0_284, %c112_285, %c0_286] : memref<1x128x1xf32, #tpu.memory_space<vmem>>, vector<1x4x1xf32>
    %369 = vector.shape_cast %368 : vector<1x4x1xf32> to vector<4x1xf32>
    %c0_287 = arith.constant 0 : index
    %c0_288 = arith.constant 0 : index
    %c116 = arith.constant 116 : index
    %370 = vector.load %arg2[%c0_287, %c0_288, %c116] : memref<1x1x128xf32, #tpu.memory_space<vmem>>, vector<1x1x12xf32>
    %371 = vector.shape_cast %370 : vector<1x1x12xf32> to vector<1x12xf32>
    %372 = vector.broadcast %369 : vector<4x1xf32> to vector<4x12xf32>
    %373 = vector.broadcast %371 : vector<1x12xf32> to vector<4x12xf32>
    %374 = arith.addf %372, %373 : vector<4x12xf32>
    %cst_289 = arith.constant 8.750000e-01 : f32
    %375 = vector.broadcast %cst_289 : f32 to vector<4x12xf32>
    %376 = arith.mulf %374, %375 : vector<4x12xf32>
    %377 = arith.mulf %367, %376 : vector<4x12xf32>
    %c112_290 = arith.constant 112 : index
    %c116_291 = arith.constant 116 : index
    %378 = vector.load %arg5[%c112_290, %c116_291] : memref<128x128xf32, #tpu.memory_space<vmem>>, vector<4x12xf32>
    tpu.vector_store %arg5[%c112_290, %c116_291], %377 {strides = array<i32>} : memref<128x128xf32, #tpu.memory_space<vmem>>, vector<4x12xf32>,
    %c0_292 = arith.constant 0 : index
    %c0_293 = arith.constant 0 : index
    %c1972 = arith.constant 1972 : index
    %379 = vector.load %arg1[%c0_292, %c0_293, %c1972] : memref<1x4x1984xf32, #tpu.memory_space<vmem>>, vector<1x4x8xf32>
    %380 = vector.shape_cast %379 : vector<1x4x8xf32> to vector<4x8xf32>
    %c0_294 = arith.constant 0 : index
    %c116_295 = arith.constant 116 : index
    %c0_296 = arith.constant 0 : index
    %381 = vector.load %arg3[%c0_294, %c116_295, %c0_296] : memref<1x128x1xf32, #tpu.memory_space<vmem>>, vector<1x4x1xf32>
    %382 = vector.shape_cast %381 : vector<1x4x1xf32> to vector<4x1xf32>
    %c0_297 = arith.constant 0 : index
    %c0_298 = arith.constant 0 : index
    %c120 = arith.constant 120 : index
    %383 = vector.load %arg2[%c0_297, %c0_298, %c120] : memref<1x1x128xf32, #tpu.memory_space<vmem>>, vector<1x1x8xf32>
    %384 = vector.shape_cast %383 : vector<1x1x8xf32> to vector<1x8xf32>
    %385 = vector.broadcast %382 : vector<4x1xf32> to vector<4x8xf32>
    %386 = vector.broadcast %384 : vector<1x8xf32> to vector<4x8xf32>
    %387 = arith.addf %385, %386 : vector<4x8xf32>
    %cst_299 = arith.constant 8.750000e-01 : f32
    %388 = vector.broadcast %cst_299 : f32 to vector<4x8xf32>
    %389 = arith.mulf %387, %388 : vector<4x8xf32>
    %390 = arith.mulf %380, %389 : vector<4x8xf32>
    %c116_300 = arith.constant 116 : index
    %c120_301 = arith.constant 120 : index
    %391 = vector.load %arg5[%c116_300, %c120_301] : memref<128x128xf32, #tpu.memory_space<vmem>>, vector<4x8xf32>
    tpu.vector_store %arg5[%c116_300, %c120_301], %390 {strides = array<i32>} : memref<128x128xf32, #tpu.memory_space<vmem>>, vector<4x8xf32>,
    %c0_302 = arith.constant 0 : index
    %c0_303 = arith.constant 0 : index
    %c1980 = arith.constant 1980 : index
    %392 = vector.load %arg1[%c0_302, %c0_303, %c1980] : memref<1x4x1984xf32, #tpu.memory_space<vmem>>, vector<1x4x4xf32>
    %393 = vector.shape_cast %392 : vector<1x4x4xf32> to vector<4x4xf32>
    %c0_304 = arith.constant 0 : index
    %c120_305 = arith.constant 120 : index
    %c0_306 = arith.constant 0 : index
    %394 = vector.load %arg3[%c0_304, %c120_305, %c0_306] : memref<1x128x1xf32, #tpu.memory_space<vmem>>, vector<1x4x1xf32>
    %395 = vector.shape_cast %394 : vector<1x4x1xf32> to vector<4x1xf32>
    %c0_307 = arith.constant 0 : index
    %c0_308 = arith.constant 0 : index
    %c124_309 = arith.constant 124 : index
    %396 = vector.load %arg2[%c0_307, %c0_308, %c124_309] : memref<1x1x128xf32, #tpu.memory_space<vmem>>, vector<1x1x4xf32>
    %397 = vector.shape_cast %396 : vector<1x1x4xf32> to vector<1x4xf32>
    %398 = vector.broadcast %395 : vector<4x1xf32> to vector<4x4xf32>
    %399 = vector.broadcast %397 : vector<1x4xf32> to vector<4x4xf32>
    %400 = arith.addf %398, %399 : vector<4x4xf32>
    %cst_310 = arith.constant 8.750000e-01 : f32
    %401 = vector.broadcast %cst_310 : f32 to vector<4x4xf32>
    %402 = arith.mulf %400, %401 : vector<4x4xf32>
    %403 = arith.mulf %393, %402 : vector<4x4xf32>
    %c120_311 = arith.constant 120 : index
    %c124_312 = arith.constant 124 : index
    %404 = vector.load %arg5[%c120_311, %c124_312] : memref<128x128xf32, #tpu.memory_space<vmem>>, vector<4x4xf32>
    tpu.vector_store %arg5[%c120_311, %c124_312], %403 {strides = array<i32>} : memref<128x128xf32, #tpu.memory_space<vmem>>, vector<4x4xf32>,
    %c0_313 = arith.constant 0 : index
    %c0_314 = arith.constant 0 : index
    %405 = vector.load %arg5[%c0_313, %c0_314] : memref<128x128xf32, #tpu.memory_space<vmem>>, vector<128x128xf32>
    %406 = tpu.iota {dimensions = array<i32: 0>} : vector<128x128xi32>
    %407 = tpu.iota {dimensions = array<i32: 1>} : vector<128x128xi32>
    %c0_315 = arith.constant 0 : index
    %c0_316 = arith.constant 0 : index
    %c0_317 = arith.constant 0 : index
    %408 = vector.load %arg2[%c0_315, %c0_316, %c0_317] : memref<1x1x128xf32, #tpu.memory_space<vmem>>, vector<1x1x128xf32>
    %409 = vector.shape_cast %408 : vector<1x1x128xf32> to vector<1x128xf32>
    %410 = arith.cmpi slt, %406, %407 : vector<128x128xi32>
    %411 = arith.cmpi sgt, %406, %407 : vector<128x128xi32>
    %412 = tpu.transpose %405, [1, 0] : vector<128x128xf32> -> vector<128x128xf32>
    %413 = vector.shape_cast %409 : vector<1x128xf32> to vector<1x128xf32>
    %414 = vector.broadcast %413 : vector<1x128xf32> to vector<128x128xf32>
    %415 = arith.select %411, %412, %414 : vector<128x128xi1>, vector<128x128xf32>
    %416 = arith.select %410, %405, %415 : vector<128x128xi1>, vector<128x128xf32>
    %c0_318 = arith.constant 0 : index
    %c0_319 = arith.constant 0 : index
    %c0_320 = arith.constant 0 : index
    %417 = vector.load %arg4[%c0_318, %c0_319, %c0_320] : memref<1x128x128xf32, #tpu.memory_space<vmem>>, vector<1x128x128xf32>
    %418 = vector.shape_cast %417 : vector<1x128x128xf32> to vector<128x128xf32>
    %419 = vector.shape_cast %416 : vector<128x128xf32> to vector<1x128x128xf32>
    tpu.vector_store %arg4[%c0_318, %c0_319, %c0_320], %419 {strides = array<i32>} : memref<1x128x128xf32, #tpu.memory_space<vmem>>, vector<1x128x128xf32>,
    return
  }
  func.func @transform_0(%arg0: i32) -> (i32, i32, i32) {
    %c0_i32 = arith.constant 0 : i32
    %c0_i32_0 = arith.constant 0 : i32
    %c0_i32_1 = arith.constant 0 : i32
    return %arg0, %c0_i32, %c0_i32_0 : i32, i32, i32
  }
  func.func @transform_1(%arg0: i32) -> (i32, i32, i32) {
    %c0_i32 = arith.constant 0 : i32
    %c0_i32_0 = arith.constant 0 : i32
    %c0_i32_1 = arith.constant 0 : i32
    return %arg0, %c0_i32, %c0_i32_0 : i32, i32, i32
  }
  func.func @transform_2(%arg0: i32) -> (i32, i32, i32) {
    %c0_i32 = arith.constant 0 : i32
    %c0_i32_0 = arith.constant 0 : i32
    %c0_i32_1 = arith.constant 0 : i32
    return %arg0, %c0_i32, %c0_i32_0 : i32, i32, i32
  }
  func.func @transform_3(%arg0: i32) -> (i32, i32, i32) {
    %c0_i32 = arith.constant 0 : i32
    %c0_i32_0 = arith.constant 0 : i32
    %c0_i32_1 = arith.constant 0 : i32
    return %arg0, %c0_i32, %c0_i32_0 : i32, i32, i32
  }
}

</mosaic_0001>

<bundles_post_ra>
// kernel: tpu_custom_call.1
= control target key start
LH: loop header
LB: loop body
LE: loop exit
PB: predicated region body
PF: predicated region fallthrough
CT: control target
= control target key end

     0   :  { %8 = vsyncpa [#allocation4], 0  ;;  %s2222_s0 = inlined_call_operand.vmem [shape: f32[2,4,1984], index: 0, kind: input, shape index: {}]   ;;  %s2223_s1 = inlined_call_operand.vmem [shape: f32[2,1,128], index: 1, kind: input, shape index: {}]   ;;  %s2224_s2 = inlined_call_operand.vmem [shape: f32[2,128,1], index: 2, kind: input, shape index: {}]   ;;  %s2225_s3 = inlined_call_operand.hbm [shape: f32[2,128,128], index: 3, kind: output, shape index: {}]  }
   0x1   :  { %10 = vsyncpa [#allocation4 + $0x1], 0  ;;  %s1668_s12 = smov 0   ;;  %s1670_s13 = smov 0  }
   0x2   :  { %s1672_s14 = smov 0   ;;  %s1674_s15 = smov 0  }
   0x3 LB: > { %s1689_s16 = sadd.s32 4294967295, %s1611_s15   ;;  %s1425_s17 = sadd.s32 4294967294, %s1611_s15   ;;  %s1611_s15 = sphi %s1674_s15, %s2283_s15   ;;  %s1607_s14 = sphi %s1672_s14, %s2282_s14   ;;  %s1603_s13 = sphi %s1670_s13, %s2281_s13   ;;  %s1599_s12 = sphi %s1668_s12, %s2280_s12  }
   0x4   : > { %s1693_s18 = sadd.s32 1, %s1611_s15   ;;  %s101_s19 = sadd.s32 1, %s1607_s14 }
   0x5   : > { %s98_s20 = ssub.s32 %s1611_s15, %s1693_s18  ;;  %p111_p0 = scmp.ne.s32.totalorder %s1607_s14, %s1603_s13 }
   0x6   : > { %p99_p1 = scmp.eq.s32.totalorder %s98_s20, 0  ;;  %p112_p2 = scmp.eq.s32.totalorder %s1689_s16, 1 }
   0x7   : > { %p117_p3 = scmp.ne.s32.totalorder %s1603_s13, %s1599_s12  ;;  %p118_p4 = scmp.eq.s32.totalorder %s1425_s17, 1 }
   0x8   : > { %s1704_s21 = scalar_select %p99_p1, %s1607_s14, %s101_s19  }
   0x9   : > { %p1706_p5 = por %p112_p2, %p111_p0  ;;  %p1710_p6 = por %p118_p4, %p117_p3 }
   0xa   : > { %p1428_p7 = scmp.ge.s32.totalorder %s1611_s15, 1  ;;  %p158_p8 = scmp.lt.s32.totalorder %s1611_s15, 3 }
   0xc   : > { %p159_p9 = pnand %p1428_p7, %p158_p8 }
   0xd   : > { %p190_p10 = scmp.lt.s32.totalorder (!%p159_p9), %s1689_s16, 1  ;;  %v1613_v0 = vmov (!%p159_p9), 0   ;;  %s2232_s5 = smov (!%p159_p9), 124   ;;  %vm266_vm0 = vcmask (!%p159_p9), 949248   ;;  %vm301_vm1 = vcmask (!%p159_p9), 850944   ;;  %vm503_vm2 = vcmask (!%p159_p9), 621568  }
   0xe   : > { %162 = sbr.rel (%p159_p9) target bundleno = 697 (0x2b9), region = 32  ;;  %1548 = vset.pattern.permute.xlu1 (!%p159_p9), %v1613_v0  ;;  %1547 = vset.pattern.permute.xlu0 (!%p159_p9), %v1613_v0  ;;  %s2230_s6 = smov (!%p159_p9), 116   ;;  %vm336_vm3 = vcmask (!%p159_p9), 719872   ;;  %vm538_vm4 = vcmask (!%p159_p9), 293888   ;;  %vm371_vm5 = vcmask (!%p159_p9), 556032   ;;  %vm600_vm6 = vcmask (!%p159_p9), 588800  }
   0xf   : > { %s2226_s7 = smov (!%p159_p9), 68   ;;  %s2229_s8 = smov (!%p159_p9), 104   ;;  %vm406_vm7 = vcmask (!%p159_p9), 359424   ;;  %vm697_vm8 = vcmask (!%p159_p9), 261120   ;;  %vm441_vm9 = vcmask (!%p159_p9), 130048   ;;  %vm821_vm10 = vcmask (!%p159_p9), 64512  }
  0x10   : > { %s1618_s9 = smov (!%p159_p9), 16   ;;  %s2228_s10 = smov (!%p159_p9), 88   ;;  %vm635_vm11 = vcmask (!%p159_p9), 162816   ;;  %vm1024_vm12 = vcmask (!%p159_p9), 31744   ;;  %vm759_vm13 = vcmask (!%p159_p9), 228352   ;;  %vm276_vm14 = vcmask (!%p159_p9), 97280  }
  0x11   : > { %s1620_s11 = smov (!%p159_p9), 36   ;;  %s1621_s17 = smov (!%p159_p9), 44   ;;  %vm244_vm15 = vcmask (!%p159_p9), 1043488  }
  0x12   : > { %s2234_s19 = smov (!%p159_p9), 112   ;;  %s2227_s20 = smov (!%p159_p9), 76  }
  0x13   : > { %s1625_s26 = smov (!%p159_p9), 72   ;;  %s1626_s27 = smov (!%p159_p9), 28  }
  0x14   : > { %s1628_s29 = smov (!%p159_p9), 8   ;;  %s2236_s30 = smov (!%p159_p9), 120  }
  0x15   : > { %s1718_s24 = scalar_select %p190_p10, %s1689_s16, 1 }
  0x17   : > { %s1472_s25 = sshll.u32 %s1718_s24, 7  ;;  %s1761_s4 = scalar_lea.vmem %s2223_s1, %s1718_s24 }
  0x18   : > { %s1724_s28 = scalar_lea.vmem %s2224_s2, %s1472_s25  ;;  %v1764_v32 = vld [vmem:[%s1761_s4] ss:$0 sm:$0xff]  ;;  %s1624_s25 = smov 32  }
  0x19   : > { %v247_v1 = vld [vmem:[%s1724_s28 + $0x4] sm:$0xf]  ;;  %v220_v2 = vld [vmem:[%s1724_s28] sm:$0xf]  ;;  %v282_v3 = vld [vmem:[%s1724_s28 + $0x8] sm:$0xf] }
  0x1a   : > { %251 = vperm.xlu1 %1548, %v247_v1   ;;  %224 = vperm.xlu0 %1547, %v220_v2   ;;  %v317_v4 = vld [vmem:[%s1724_s28 + $0xc] sm:$0xf]  ;;  %v352_v5 = vld [vmem:[%s1724_s28 + $0x10] sm:$0xf]  ;;  %v387_v6 = vld [vmem:[%s1724_s28 + $0x14] sm:$0xf] }
  0x1b   : > { %v422_v7 = vld [vmem:[%s1724_s28 + $0x18] sm:$0xf]  ;;  %v484_v8 = vld [vmem:[%s1724_s28 + $0x20] sm:$0xf]  ;;  %v519_v9 = vld [vmem:[%s1724_s28 + $0x24] sm:$0xf] }
  0x1c   : > { %v581_v10 = vld [vmem:[%s1724_s28 + $0x2c] sm:$0xf]  ;;  %v457_v11 = vld [vmem:[%s1724_s28 + $0x1c] sm:$0xf]  ;;  %v616_v12 = vld [vmem:[%s1724_s28 + $0x30] sm:$0xf] }
  0x1d   : > { %v678_v13 = vld [vmem:[%s1724_s28 + $0x38] sm:$0xf]  ;;  %v554_v14 = vld [vmem:[%s1724_s28 + $0x28] sm:$0xf]  ;;  %v740_v15 = vld [vmem:[%s1724_s28 + $0x40] sm:$0xf] }
  0x1e   : > { %286 = vperm.xlu1 %1548, %v282_v3   ;;  %321 = vperm.xlu0 %1547, %v317_v4   ;;  %v651_v16 = vld [vmem:[%s1724_s28 + $0x34] sm:$0xf]  ;;  %v802_v17 = vld [vmem:[%s1724_s28 + $0x48] sm:$0xf]  ;;  %v713_v18 = vld [vmem:[%s1724_s28 + $0x3c] sm:$0xf] }
  0x1f   : > { %v891_v19 = vld [vmem:[%s1724_s28 + $0x54] sm:$0xf]  ;;  %v775_v20 = vld [vmem:[%s1724_s28 + $0x44] sm:$0xf]  ;;  %v837_v21 = vld [vmem:[%s1724_s28 + $0x4c] sm:$0xf] }
  0x20   : > { %v1005_v22 = vld [vmem:[%s1724_s28 + $0x64] sm:$0xf]  ;;  %v864_v23 = vld [vmem:[%s1724_s28 + $0x50] sm:$0xf]  ;;  %v924_v24 = vld [vmem:[%s1724_s28 + $0x58] sm:$0xf] }
  0x21   : > { %v951_v25 = vld [vmem:[%s1724_s28 + $0x5c] sm:$0xf]  ;;  %v978_v26 = vld [vmem:[%s1724_s28 + $0x60] sm:$0xf]  ;;  %v1040_v27 = vld [vmem:[%s1724_s28 + $0x68] sm:$0xf] }
  0x22   : > { %356 = vperm.xlu1 %1548, %v352_v5   ;;  %391 = vperm.xlu0 %1547, %v387_v6   ;;  %v1067_v28 = vld [vmem:[%s1724_s28 + $0x6c] sm:$0xf]  ;;  %v1094_v29 = vld [vmem:[%s1724_s28 + $0x70] sm:$0xf]  ;;  %v1121_v30 = vld [vmem:[%s1724_s28 + $0x74] sm:$0xf] }
  0x23   : > { %v1148_v31 = vld [vmem:[%s1724_s28 + $0x78] sm:$0xf]  ;;  %s1627_s28 = smov 20  }
  0x26   : > { %426 = vperm.xlu1 %1548, %v422_v7   ;;  %488 = vperm.xlu0 %1547, %v484_v8  }
  0x2a   : > { %523 = vperm.xlu1 %1548, %v519_v9   ;;  %585 = vperm.xlu0 %1547, %v581_v10  }
  0x2e   : > { %461 = vperm.xlu1 %1548, %v457_v11   ;;  %620 = vperm.xlu0 %1547, %v616_v12  }
  0x32   : > { %682 = vperm.xlu1 %1548, %v678_v13   ;;  %558 = vperm.xlu0 %1547, %v554_v14  }
  0x36   : > { %744 = vperm.xlu1 %1548, %v740_v15   ;;  %655 = vperm.xlu0 %1547, %v651_v16  }
  0x3a   : > { %806 = vperm.xlu1 %1548, %v802_v17   ;;  %717 = vperm.xlu0 %1547, %v713_v18  }
  0x3e   : > { %895 = vperm.xlu1 %1548, %v891_v19   ;;  %779 = vperm.xlu0 %1547, %v775_v20  }
  0x42   : > { %841 = vperm.xlu1 %1548, %v837_v21   ;;  %1009 = vperm.xlu0 %1547, %v1005_v22  }
  0x46   : > { %868 = vperm.xlu1 %1548, %v864_v23   ;;  %928 = vperm.xlu0 %1547, %v924_v24  }
  0x4a   : > { %955 = vperm.xlu1 %1548, %v951_v25   ;;  %982 = vperm.xlu0 %1547, %v978_v26  }
  0x4e   : > { %1044 = vperm.xlu1 %1548, %v1040_v27   ;;  %1071 = vperm.xlu0 %1547, %v1067_v28  }
  0x52   : > { %1098 = vperm.xlu1 %1548, %v1094_v29   ;;  %1125 = vperm.xlu0 %1547, %v1121_v30  }
  0x56   : > { %1152 = vperm.xlu1 %1548, %v1148_v31  }
  0x99   : > { %v252_v33 = vpop.permute.xlu1 %251  ;;  %v225_v34 = vpop.permute.xlu0 %224 }
  0x9a   : > { %v260_v35 = vadd.f32 %v1764_v32, %v252_v33  ;;  %v233_v36 = vadd.f32 %v1764_v32, %v225_v34 }
  0x9c   : > { %v234_v37 = vmul.f32 0.875, %v233_v36  ;;  %v261_v40 = vmul.f32 0.875, %v260_v35 }
  0x9d   : > { %v287_v38 = vpop.permute.xlu1 %286  ;;  %v322_v39 = vpop.permute.xlu0 %321 }
  0x9e   : > { %236 = vrot.lane.b32.xlu0 %v234_v37, %s2232_s5  ;;  %v295_v41 = vadd.f32 %v1764_v32, %v287_v38  ;;  %v330_v46 = vadd.f32 %v1764_v32, %v322_v39  ;;  %s2240_s5 = smov 84  }
  0xa0   : > { %v296_v45 = vmul.f32 0.875, %v295_v41  ;;  %v331_v51 = vmul.f32 0.875, %v330_v46 }
  0xa1   : > { %v357_v42 = vpop.permute.xlu1 %356  ;;  %v392_v43 = vpop.permute.xlu0 %391 }
  0xa2   : > { %v365_v44 = vadd.f32 %v1764_v32, %v357_v42  ;;  %263 = vrot.lane.b32.xlu0 %v261_v40, %s2230_s6  ;;  %v400_v52 = vadd.f32 %v1764_v32, %v392_v43  ;;  %s2238_s6 = smov 100  }
  0xa4   : > { %v366_v47 = vmul.f32 0.875, %v365_v44  ;;  %v401_v57 = vmul.f32 0.875, %v400_v52 }
  0xa5   : > { %v427_v48 = vpop.permute.xlu1 %426  ;;  %v489_v49 = vpop.permute.xlu0 %488 }
  0xa6   : > { %v435_v50 = vadd.f32 %v1764_v32, %v427_v48  ;;  %368 = vrot.lane.b32.xlu1 %v366_v47, %s2226_s7  ;;  %298 = vrot.lane.b32.xlu0 %v296_v45, %s2229_s8  ;;  %v497_v58 = vadd.f32 %v1764_v32, %v489_v49  ;;  %s2250_s7 = smov 12   ;;  %s2242_s8 = smov 96  }
  0xa8   : > { %v436_v53 = vmul.f32 0.875, %v435_v50  ;;  %v498_v63 = vmul.f32 0.875, %v497_v58 }
  0xa9   : > { %v524_v54 = vpop.permute.xlu1 %523  ;;  %v586_v55 = vpop.permute.xlu0 %585 }
  0xaa   : > { %v532_v56 = vadd.f32 %v1764_v32, %v524_v54  ;;  %438 = vrot.lane.b32.xlu1 %v436_v53, %s1618_s9  ;;  %333 = vrot.lane.b32.xlu0 %v331_v51, %s2228_s10  ;;  %v594_v0 = vadd.f32 %v1764_v32, %v586_v55  ;;  %s2244_s10 = smov 56  }
  0xac   : > { %v533_v59 = vmul.f32 0.875, %v532_v56  ;;  %v595_v5 = vmul.f32 0.875, %v594_v0 }
  0xad   : > { %v462_v60 = vpop.permute.xlu1 %461  ;;  %v621_v61 = vpop.permute.xlu0 %620 }
  0xae   : > { %v470_v62 = vadd.f32 %v1764_v32, %v462_v60  ;;  %535 = vrot.lane.b32.xlu1 %v533_v59, %s1620_s11  ;;  %403 = vrot.lane.b32.xlu0 %v401_v57, %s1621_s17  ;;  %v629_v6 = vadd.f32 %v1764_v32, %v621_v61 }
  0xb0   : > { %v471_v1 = vmul.f32 0.875, %v470_v62  ;;  %v630_v11 = vmul.f32 0.875, %v629_v6 }
  0xb1   : > { %v683_v2 = vpop.permute.xlu1 %682  ;;  %v559_v3 = vpop.permute.xlu0 %558 }
  0xb2   : > { %v691_v4 = vadd.f32 %v1764_v32, %v683_v2  ;;  %473 = vrot.lane.b32.xlu1 %v471_v1, %s2234_s19  ;;  %500 = vrot.lane.b32.xlu0 %v498_v63, %s2227_s20  ;;  %v567_v12 = vadd.f32 %v1764_v32, %v559_v3  ;;  %s2246_s20 = smov 92   ;;  %s1636_s19 = smov 80   ;;  %v1645_v63 = vmov 0.0  }
  0xb3   : > { %203 = vst [vmem:[#allocation2] sm:$0xff] %v1645_v63  ;;  %204 = vst [vmem:[#allocation2 + $0x8] sm:$0xff] %v1645_v63 }
  0xb4   : > { %v692_v7 = vmul.f32 0.875, %v691_v4  ;;  %v568_v17 = vmul.f32 0.875, %v567_v12  ;;  %205 = vst [vmem:[#allocation2 + $0x10] sm:$0xff] %v1645_v63  ;;  %206 = vst [vmem:[#allocation2 + $0x18] sm:$0xff] %v1645_v63 }
  0xb5   : > { %v745_v8 = vpop.permute.xlu1 %744  ;;  %v656_v9 = vpop.permute.xlu0 %655  ;;  %207 = vst [vmem:[#allocation2 + $0x20] sm:$0xff] %v1645_v63  ;;  %208 = vst [vmem:[#allocation2 + $0x28] sm:$0xff] %v1645_v63 }
  0xb6   : > { %v753_v10 = vadd.f32 %v1764_v32, %v745_v8  ;;  %694 = vrot.lane.b32.xlu1 %v692_v7, %s1624_s25  ;;  %597 = vrot.lane.b32.xlu0 %v595_v5, %s1625_s26  ;;  %v664_v18 = vadd.f32 %v1764_v32, %v656_v9  ;;  %209 = vst [vmem:[#allocation2 + $0x30] sm:$0xff] %v1645_v63  ;;  %210 = vst [vmem:[#allocation2 + $0x38] sm:$0xff] %v1645_v63 }
  0xb7   : > { %211 = vst [vmem:[#allocation2 + $0x40] sm:$0xff] %v1645_v63  ;;  %212 = vst [vmem:[#allocation2 + $0x48] sm:$0xff] %v1645_v63 }
  0xb8   : > { %v754_v13 = vmul.f32 0.875, %v753_v10  ;;  %v665_v23 = vmul.f32 0.875, %v664_v18  ;;  %213 = vst [vmem:[#allocation2 + $0x50] sm:$0xff] %v1645_v63  ;;  %214 = vst [vmem:[#allocation2 + $0x58] sm:$0xff] %v1645_v63 }
  0xb9   : > { %v807_v14 = vpop.permute.xlu1 %806  ;;  %v718_v15 = vpop.permute.xlu0 %717  ;;  %215 = vst [vmem:[#allocation2 + $0x60] sm:$0xff] %v1645_v63  ;;  %216 = vst [vmem:[#allocation2 + $0x68] sm:$0xff] %v1645_v63 }
  0xba   : > { %v815_v16 = vadd.f32 %v1764_v32, %v807_v14  ;;  %756 = vrot.lane.b32.xlu1 %v754_v13, %s1626_s27  ;;  %632 = vrot.lane.b32.xlu0 %v630_v11, %s1627_s28  ;;  %v726_v24 = vadd.f32 %v1764_v32, %v718_v15  ;;  %217 = vst [vmem:[#allocation2 + $0x70] sm:$0xff] %v1645_v63  ;;  %218 = vst [vmem:[#allocation2 + $0x78] sm:$0xff] %v1645_v63 }
  0xbc   : > { %v816_v19 = vmul.f32 0.875, %v815_v16  ;;  %v727_v29 = vmul.f32 0.875, %v726_v24 }
  0xbd   : > { %v896_v20 = vpop.permute.xlu1 %895  ;;  %v780_v21 = vpop.permute.xlu0 %779 }
  0xbe   : > { %v904_v22 = vadd.f32 %v1764_v32, %v896_v20  ;;  %818 = vrot.lane.b32.xlu1 %v816_v19, %s1628_s29  ;;  %570 = vrot.lane.b32.xlu0 %v568_v17, %s2236_s30  ;;  %v788_v30 = vadd.f32 %v1764_v32, %v780_v21  ;;  %s1637_s30 = smov 4  }
  0xc0   : > { %v905_v25 = vmul.f32 0.875, %v904_v22  ;;  %v789_v36 = vmul.f32 0.875, %v788_v30 }
  0xc1   : > { %v842_v26 = vpop.permute.xlu1 %841  ;;  %v1010_v27 = vpop.permute.xlu0 %1009 }
  0xc2   : > { %v850_v28 = vadd.f32 %v1764_v32, %v842_v26  ;;  %907 = vrot.lane.b32.xlu1 %v905_v25, %s2250_s7  ;;  %667 = vrot.lane.b32.xlu0 %v665_v23, %s2246_s20  ;;  %v1018_v37 = vadd.f32 %v1764_v32, %v1010_v27  ;;  %s2252_s20 = smov 64   ;;  %s2255_s7 = smov 60  }
  0xc4   : > { %v851_v31 = vmul.f32 0.875, %v850_v28  ;;  %v1019_v42 = vmul.f32 0.875, %v1018_v37 }
  0xc5   : > { %v869_v33 = vpop.permute.xlu1 %868  ;;  %v929_v34 = vpop.permute.xlu0 %928 }
  0xc6   : > { %v877_v35 = vadd.f32 %v1764_v32, %v869_v33  ;;  %853 = vrot.lane.b32.xlu1 %v851_v31, %s2244_s10  ;;  %729 = vrot.lane.b32.xlu0 %v727_v29, %s2242_s8  ;;  %v937_v43 = vadd.f32 %v1764_v32, %v929_v34  ;;  %s1640_s8 = smov 52   ;;  %s2253_s10 = smov 108  }
  0xc8   : > { %v878_v38 = vmul.f32 0.875, %v877_v35  ;;  %v938_v48 = vmul.f32 0.875, %v937_v43 }
  0xc9   : > { %v956_v39 = vpop.permute.xlu1 %955  ;;  %v983_v40 = vpop.permute.xlu0 %982 }
  0xca   : > { %v964_v41 = vadd.f32 %v1764_v32, %v956_v39  ;;  %880 = vrot.lane.b32.xlu1 %v878_v38, %s2238_s6  ;;  %791 = vrot.lane.b32.xlu0 %v789_v36, %s2240_s5  ;;  %v991_v49 = vadd.f32 %v1764_v32, %v983_v40  ;;  %s2248_s6 = smov 24   ;;  %s1639_s5 = smov 48  }
  0xcc   : > { %v965_v44 = vmul.f32 0.875, %v964_v41  ;;  %v992_v53 = vmul.f32 0.875, %v991_v49 }
  0xcd   : > { %v1045_v45 = vpop.permute.xlu1 %1044  ;;  %v1072_v47 = vpop.permute.xlu0 %1071 }
  0xce   : > { %v1053_v46 = vadd.f32 %v1764_v32, %v1045_v45  ;;  %967 = vrot.lane.b32.xlu1 %v965_v44, %s1636_s19  ;;  %1021 = vrot.lane.b32.xlu0 %v1019_v42, %s1637_s30  ;;  %v1080_v54 = vadd.f32 %v1764_v32, %v1072_v47 }
  0xd0   : > { %v1054_v50 = vmul.f32 0.875, %v1053_v46  ;;  %v1081_v59 = vmul.f32 0.875, %v1080_v54 }
  0xd1   : > { %v1099_v51 = vpop.permute.xlu1 %1098  ;;  %v1126_v56 = vpop.permute.xlu0 %1125 }
  0xd2   : > { %v1107_v52 = vadd.f32 %v1764_v32, %v1099_v51  ;;  %1056 = vrot.lane.b32.xlu1 %v1054_v50, %s2248_s6  ;;  %940 = vrot.lane.b32.xlu0 %v938_v48, %s1639_s5  ;;  %v1134_v60 = vadd.f32 %v1764_v32, %v1126_v56  ;;  %s2257_s6 = smov 40  }
  0xd4   : > { %v1108_v55 = vmul.f32 0.875, %v1107_v52  ;;  %v1135_v62 = vmul.f32 0.875, %v1134_v60 }
  0xd5   : > { %v1153_v57 = vpop.permute.xlu1 %1152 }
  0xd6   : > { %v1161_v58 = vadd.f32 %v1764_v32, %v1153_v57  ;;  %1110 = vrot.lane.b32.xlu1 %v1108_v55, %s1640_s8  ;;  %994 = vrot.lane.b32.xlu0 %v992_v53, %s2253_s10  ;;  %s2265_s10 = smov 56  }
  0xd8   : > { %v1162_v61 = vmul.f32 0.875, %v1161_v58 }
  0xda   : > { %1164 = vrot.lane.b32.xlu1 %v1162_v61, %s2252_s20  ;;  %1083 = vrot.lane.b32.xlu0 %v1081_v59, %s2257_s6  ;;  %s1471_s20 = sshll.u32 %s1718_s24, 6  ;;  %s2261_s24 = smov 12  }
  0xdb   : > { %s1832_s6 = scalar_lea.vmem %s2222_s0, %s1471_s20  ;;  %s2269_s20 = smov 120  }
  0xdc   : > { %v219_v32 = vld [vmem:[%s1832_s6] sm:$0xf]  ;;  %v456_v9 = vld [vmem:[%s1832_s6 + $0x18] sm:$0xf]  ;;  %v650_v21 = vld [vmem:[%s1832_s6 + $0x28] sm:$0xf] }
  0xdd   : > { %v553_v17 = vld [vmem:[%s1832_s6 + $0x20] sm:$0xf]  ;;  %v712_v25 = vld [vmem:[%s1832_s6 + $0x2c] sm:$0xf]  ;;  %v836_v29 = vld [vmem:[%s1832_s6 + $0x34] sm:$0xf] }
  0xde   : > { %1137 = vrot.lane.b32.xlu0 %v1135_v62, %s2255_s7  ;;  %v774_v30 = vld [vmem:[%s1832_s6 + $0x30] sm:$0xf]  ;;  %v863_v36 = vld [vmem:[%s1832_s6 + $0x34] sm:$0xf]  ;;  %v950_v41 = vld [vmem:[%s1832_s6 + $0x38] sm:$0xf] }
  0xdf   : > { %v923_v42 = vld [vmem:[%s1832_s6 + $0x38] sm:$0xf]  ;;  %v246_v46 = vld [vmem:[%s1832_s6] sm:$0xff]  ;;  %v316_v63 = vld [vmem:[%s1832_s6 + $0x8] sm:$0xff]  ;;  %s2263_s7 = smov 92  }
  0xe0   : > { %v977_v50 = vld [vmem:[%s1832_s6 + $0x38] sm:$0xf]  ;;  %v281_v54 = vld [vmem:[%s1832_s6 + $0x4] sm:$0xff] }
  0xe1   : > { %v483_v59 = vld [vmem:[%s1832_s6 + $0x18] sm:$0xff] }
 0x110   : > { %v237_v0 = vpop.permute.xlu0 %236 }
 0x111   : > { %v239_v1 = vmul.f32 %v237_v0, %v219_v32  ;;  %v518_v0 = vld [vmem:[%s1832_s6 + $0x1c] sm:$0xff] }
 0x113   : > { %241 = vrot.lane.b32.xlu1 %v239_v1, %s1637_s30  ;;  %s2274_s30 = smov 116  }
 0x114   : > { %v264_v2 = vpop.permute.xlu0 %263 }
 0x115   : > { %v265_v39 = vrot.slane %v264_v2, 4 }
 0x117   : > { %v267_v47 = vsel %vm266_vm0, %v265_v39, %v264_v2 }
 0x118   : > { %v1836_v3 = vpop.permute.xlu1 %368  ;;  %v1838_v4 = vpop.permute.xlu0 %298  ;;  %v1884_v52 = vmul.f32 %v267_v47, %v246_v46 }
 0x119   : > { %v300_v48 = vrot.slane %v1838_v4, 4  ;;  %v370_v62 = vrot.slane %v1836_v3, 4 }
 0x11b   : > { %v302_v55 = vsel %vm301_vm1, %v300_v48, %v1838_v4  ;;  %vm481_vm1 = vcmask 1043712  }
 0x11c   : > { %v1840_v5 = vpop.permute.xlu1 %438  ;;  %v1842_v6 = vpop.permute.xlu0 %333  ;;  %v1894_v60 = vmul.f32 %v302_v55, %v281_v54 }
 0x11d   : > { %v335_v56 = vrot.slane %v1842_v6, 4 }
 0x11e   : > { %v306_v46 = vcombine.high %v1894_v60, %v1894_v60 }
 0x11f   : > { %v337_v32 = vsel %vm336_vm3, %v335_v56, %v1842_v6  ;;  %v351_v6 = vld [vmem:[%s1832_s6 + $0xc] sm:$0xff]  ;;  %vm675_vm3 = vcmask 1043904  }
 0x120   : > { %v1844_v7 = vpop.permute.xlu1 %535  ;;  %v1846_v8 = vpop.permute.xlu0 %403  ;;  %v1908_v4 = vmul.f32 %v337_v32, %v316_v63  ;;  %v1066_v63 = vld [vmem:[%s1832_s6 + $0x3c] sm:$0xf] }
 0x121   : > { %v537_v57 = vrot.slane %v1844_v7, 4 }
 0x122   : > { %v341_v47 = vcombine.high %v1908_v4, %v1908_v4 }
 0x123   : > { %v539_v1 = vsel %vm538_vm4, %v537_v57, %v1844_v7  ;;  %v405_v7 = vrot.slane %v1846_v8, 4  ;;  %vm737_vm4 = vcmask 1043968  }
 0x124   : > { %v474_v10 = vpop.permute.xlu1 %473  ;;  %v501_v11 = vpop.permute.xlu0 %500 }
 0x125   : > { %v476_v12 = vmul.f32 %v474_v10, %v456_v9  ;;  %v502_v49 = vrot.slane %v501_v11, 4  ;;  %v1910_v9 = vmul.f32 %v539_v1, %v518_v0  ;;  %v372_v10 = vsel %vm371_vm5, %v370_v62, %v1836_v3 }
 0x126   : > { %v440_v3 = vrot.slane %v1840_v5, 4  ;;  %vm861_vm5 = vcmask 1044096  }
 0x127   : > { %478 = vrot.lane.b32.xlu1 %v476_v12, %s1618_s9  ;;  %v504_v58 = vsel %vm503_vm2, %v502_v49, %v501_v11  ;;  %v580_v12 = vld [vmem:[%s1832_s6 + $0x20] sm:$0xff]  ;;  %s2264_s9 = smov 40   ;;  %v543_v49 = vcombine.high %v1910_v9, %v1910_v9  ;;  %vm578_vm2 = vcmask 1043808  }
 0x128   : > { %v1850_v13 = vpop.permute.xlu1 %694  ;;  %v1852_v14 = vpop.permute.xlu0 %597  ;;  %v1896_v61 = vmul.f32 %v504_v58, %v483_v59  ;;  %v1039_v58 = vld [vmem:[%s1832_s6 + $0x3c] sm:$0xf] }
 0x129   : > { %v599_v2 = vrot.slane %v1852_v14, 4  ;;  %v696_v11 = vrot.slane %v1850_v13, 4 }
 0x12a   : > { %v508_v48 = vcombine.high %v1896_v61, %v1896_v61 }
 0x12c   : > { %v1854_v15 = vpop.permute.xlu1 %756  ;;  %v1856_v16 = vpop.permute.xlu0 %632 }
 0x130   : > { %v1859_v18 = vpop.permute.xlu1 %818  ;;  %v571_v19 = vpop.permute.xlu0 %570 }
 0x131   : > { %v573_v20 = vmul.f32 %v571_v19, %v553_v17  ;;  %v601_v17 = vsel %vm600_vm6, %v599_v2, %v1852_v14  ;;  %v374_v19 = vmul.f32 %v372_v10, %v351_v6  ;;  %v698_v14 = vsel %vm697_vm8, %v696_v11, %v1850_v13  ;;  %v1093_v2 = vld [vmem:[%s1832_s6 + $0x3c] sm:$0xf] }
 0x132   : > { %v1147_v6 = vld [vmem:[%s1832_s6 + $0x3c] sm:$0xf]  ;;  %vm799_vm6 = vcmask 1044032   ;;  %vm948_vm8 = vcmask 1044192  }
 0x133   : > { %575 = vrot.lane.b32.xlu0 %v573_v20, %s1628_s29  ;;  %v1922_v20 = vmul.f32 %v601_v17, %v580_v12 }
 0x134   : > { %v1863_v22 = vpop.permute.xlu1 %907  ;;  %v668_v23 = vpop.permute.xlu0 %667 }
 0x135   : > { %v670_v24 = vmul.f32 %v668_v23, %v650_v21  ;;  %v386_v21 = vld [vmem:[%s1832_s6 + $0x10] sm:$0xff]  ;;  %v407_v23 = vsel %vm406_vm7, %v405_v7, %v1846_v8  ;;  %v634_v8 = vrot.slane %v1856_v16, 4  ;;  %v1120_v7 = vld [vmem:[%s1832_s6 + $0x3c] sm:$0xf]  ;;  %vm888_vm7 = vcmask 1044128  }
 0x137   : > { %672 = vrot.lane.b32.xlu1 %v670_v24, %s1620_s11  ;;  %v677_v24 = vld [vmem:[%s1832_s6 + $0x28] sm:$0xff]  ;;  %s2266_s11 = smov 60  }
 0x138   : > { %v854_v26 = vpop.permute.xlu1 %853  ;;  %v730_v27 = vpop.permute.xlu0 %729 }
 0x139   : > { %v732_v28 = vmul.f32 %v730_v27, %v712_v25  ;;  %v856_v34 = vmul.f32 %v854_v26, %v836_v29  ;;  %v820_v25 = vrot.slane %v1859_v18, 4  ;;  %v409_v26 = vmul.f32 %v407_v23, %v386_v21 }
 0x13a   : > { %v700_v27 = vmul.f32 %v698_v14, %v677_v24  ;;  %v442_v29 = vsel %vm441_vm9, %v440_v3, %v1840_v5  ;;  %v636_v5 = vsel %vm635_vm11, %v634_v8, %v1856_v16  ;;  %vm975_vm9 = vcmask 1044224  }
 0x13b   : > { %734 = vrot.lane.b32.xlu0 %v732_v28, %s1624_s25  ;;  %v421_v28 = vld [vmem:[%s1832_s6 + $0x14] sm:$0xff]  ;;  %v822_v13 = vsel %vm821_vm10, %v820_v25, %v1859_v18  ;;  %s2270_s25 = smov 112   ;;  %vm1002_vm10 = vcmask 1044256   ;;  %vm279_vm11 = vcmask 1043520  }
 0x13c   : > { %v881_v31 = vpop.permute.xlu1 %880  ;;  %v792_v33 = vpop.permute.xlu0 %791  ;;  %v702_v54 = vcombine.high %v700_v27, %v700_v27 }
 0x13d   : > { %v794_v35 = vmul.f32 %v792_v33, %v774_v30  ;;  %v883_v38 = vmul.f32 %v881_v31, %v863_v36  ;;  %v801_v30 = vld [vmem:[%s1832_s6 + $0x30] sm:$0xff]  ;;  %v444_v33 = vmul.f32 %v442_v29, %v421_v28  ;;  %v615_v36 = vld [vmem:[%s1832_s6 + $0x24] sm:$0xff] }
 0x13e   : > { %v638_v39 = vmul.f32 %v636_v5, %v615_v36 }
 0x13f   : > { %858 = vrot.lane.b32.xlu0 %v856_v34, %s1625_s26  ;;  %796 = vrot.lane.b32.xlu1 %v794_v35, %s1621_s17  ;;  %s2267_s17 = smov 96   ;;  %v824_v34 = vmul.f32 %v822_v13, %v801_v30  ;;  %v758_v35 = vrot.slane %v1854_v15, 4  ;;  %s2271_s26 = smov 124  }
 0x140   : > { %v1873_v37 = vpop.permute.xlu0 %1021  ;;  %v968_v40 = vpop.permute.xlu1 %967  ;;  %v640_v56 = vcombine.high %v638_v39, %v638_v39 }
 0x141   : > { %v970_v44 = vmul.f32 %v968_v40, %v950_v41  ;;  %v1023_v31 = vrot.slane %v1873_v37, 4  ;;  %v739_v41 = vld [vmem:[%s1832_s6 + $0x2c] sm:$0xff]  ;;  %v826_v57 = vcombine.high %v824_v34, %v824_v34 }
 0x143   : > { %885 = vrot.lane.b32.xlu1 %v883_v38, %s1626_s27  ;;  %v1004_v38 = vld [vmem:[%s1832_s6 + $0x38] sm:$0xff]  ;;  %v1025_v18 = vsel %vm1024_vm12, %v1023_v31, %v1873_v37  ;;  %s2272_s27 = smov 108   ;;  %v271_v37 = vcombine.high %v1884_v52, %v1884_v52  ;;  %vm311_vm12 = vcmask 195584  }
 0x144   : > { %v941_v43 = vpop.permute.xlu0 %940  ;;  %v1027_v40 = vmul.f32 %v1025_v18, %v1004_v38 }
 0x145   : > { %v943_v45 = vmul.f32 %v941_v43, %v923_v42  ;;  %v760_v42 = vsel %vm759_vm13, %v758_v35, %v1854_v15  ;;  %v909_v43 = vrot.slane %v1863_v22, 4  ;;  %vm314_vm13 = vcmask 1043552  }
 0x146   : > { %v762_v16 = vmul.f32 %v760_v42, %v739_v41  ;;  %v1029_v32 = vcombine.high %v1027_v40, %v1027_v40 }
 0x147   : > { %945 = vrot.lane.b32.xlu0 %v943_v45, %s1636_s19  ;;  %972 = vrot.lane.b32.xlu1 %v970_v44, %s1639_s5  ;;  %s2262_s5 = smov 24   ;;  %s2268_s19 = smov 84   ;;  %v890_v44 = vld [vmem:[%s1832_s6 + $0x34] sm:$0xff]  ;;  %v910_v45 = vsel %vm276_vm14, %v909_v43, %v1863_v22  ;;  %v376_v22 = vcombine.high %v374_v19, %v374_v19 }
 0x148   : > { %v995_v51 = vpop.permute.xlu0 %994  ;;  %v912_v15 = vmul.f32 %v910_v45, %v890_v44  ;;  %v764_v59 = vcombine.high %v762_v16, %v762_v16  ;;  %s187_s6 = sand.u32 1, %s1603_s13  }
 0x149   : > { %v997_v53 = vmul.f32 %v995_v51, %v977_v50  ;;  %v1057_v50 = vpop.permute.xlu1 %1056  ;;  %v411_v51 = vcombine.high %v409_v26, %v409_v26 }
 0x14b   : > { %999 = vrot.lane.b32.xlu0 %v997_v53, %s1627_s28  ;;  %272 = vrot.lane.b32.xlu1 %v1884_v52, %s2261_s24  ;;  %s2273_s28 = smov 100   ;;  %v605_v52 = vcombine.high %v1922_v20, %v1922_v20  ;;  %v446_v53 = vcombine.high %v444_v33, %v444_v33 }
 0x14c   : > { %v1084_v62 = vpop.permute.xlu0 %1083 }
 0x14d   : > { %v1111_v55 = vpop.permute.xlu1 %1110  ;;  %v1086_v0 = vmul.f32 %v1084_v62, %v1066_v63 }
 0x14f   : > { %509 = vrot.lane.b32.xlu0 %v1896_v61, %s1640_s8  ;;  %307 = vrot.lane.b32.xlu1 %v1894_v60, %s2262_s5  ;;  %v1059_v60 = vmul.f32 %v1057_v50, %v1039_v58 }
 0x150   : > { %v1138_v10 = vpop.permute.xlu0 %1137 }
 0x151   : > { %v1165_v61 = vpop.permute.xlu1 %1164  ;;  %v1140_v12 = vmul.f32 %v1138_v10, %v1120_v7 }
 0x152   : > { %v1167_v11 = vmul.f32 %v1165_v61, %v1147_v6 }
 0x153   : > { %544 = vrot.lane.b32.xlu0 %v1910_v9, %s2263_s7  ;;  %342 = vrot.lane.b32.xlu1 %v1908_v4, %s2264_s9  ;;  %v914_v4 = vcombine.high %v912_v15, %v912_v15  ;;  %v1113_v9 = vmul.f32 %v1111_v55, %v1093_v2 }
 0x157   : > { %606 = vrot.lane.b32.xlu0 %v1922_v20, %s2265_s10  ;;  %377 = vrot.lane.b32.xlu1 %v374_v19, %s2266_s11 }
 0x15b   : > { %703 = vrot.lane.b32.xlu0 %v700_v27, %s2267_s17  ;;  %412 = vrot.lane.b32.xlu1 %v409_v26, %s2268_s19 }
 0x15f   : > { %827 = vrot.lane.b32.xlu0 %v824_v34, %s2269_s20  ;;  %447 = vrot.lane.b32.xlu1 %v444_v33, %s2270_s25 }
 0x163   : > { %1030 = vrot.lane.b32.xlu0 %v1027_v40, %s2271_s26  ;;  %641 = vrot.lane.b32.xlu1 %v638_v39, %s2272_s27 }
 0x167   : > { %274 = vrot.lane.b32.xlu0 %v271_v37, %s2261_s24  ;;  %765 = vrot.lane.b32.xlu1 %v762_v16, %s2273_s28  ;;  %s2276_s24 = smov 88  }
 0x16b   : > { %309 = vrot.lane.b32.xlu0 %v306_v46, %s2262_s5  ;;  %915 = vrot.lane.b32.xlu1 %v912_v15, %s2274_s30  ;;  %s2277_s5 = smov 76  }
 0x16f   : > { %344 = vrot.lane.b32.xlu0 %v341_v47, %s2264_s9  ;;  %511 = vrot.lane.b32.xlu1 %v508_v48, %s1640_s8  ;;  %s2275_s8 = smov 104   ;;  %s2279_s9 = smov 64  }
 0x173   : > { %379 = vrot.lane.b32.xlu0 %v376_v22, %s2266_s11  ;;  %546 = vrot.lane.b32.xlu1 %v543_v49, %s2263_s7  ;;  %s2278_s7 = smov 68  }
 0x177   : > { %414 = vrot.lane.b32.xlu0 %v411_v51, %s2268_s19  ;;  %608 = vrot.lane.b32.xlu1 %v605_v52, %s2265_s10  ;;  %s1429_s10 = sshll.u32 %s187_s6, 7 }
 0x178   : > { %s2079_s11 = scalar_lea.vmem [#allocation3], %s1429_s10 }
 0x17b   : > { %449 = vrot.lane.b32.xlu0 %v446_v53, %s2270_s25  ;;  %705 = vrot.lane.b32.xlu1 %v702_v54, %s2267_s17  ;;  %s1342_s17 = sshll.u32 %s2079_s11, 4  ;;  %s2174_s17 = int_to_ptr.vmem [resolvable:$true] %s1342_s17 }
 0x17f   : > { %643 = vrot.lane.b32.xlu0 %v640_v56, %s2272_s27  ;;  %829 = vrot.lane.b32.xlu1 %v826_v57, %s2269_s20  ;;  %s1646_s27 = smov [#allocation3]  }
 0x183   : > { %767 = vrot.lane.b32.xlu0 %v764_v59, %s2273_s28  ;;  %1061 = vrot.lane.b32.xlu1 %v1059_v60, %s2275_s8  ;;  %s1553_s28 = sshll.u32 %s1646_s27, 4  ;;  %s1554_s28 = int_to_ptr.vmem [resolvable:$false] %s1553_s28 }
 0x184   : > { %p1556_p0 = scmp.lt.s32.totalorder %s2174_s17, %s1554_s28 }
 0x185   : > { %v242_v1 = vpop.permute.xlu1 %241 }
 0x186   : > { %245 = vst.msk [vmem:[#allocation2] sm:$0xf] %vm244_vm15, %v242_v1  ;;  %vm346_vm15 = vcmask 326656  }
 0x187   : > { %1088 = vrot.lane.b32.xlu0 %v1086_v0, %s2276_s24  ;;  %1032 = vrot.lane.b32.xlu1 %v1029_v32, %s2271_s26  ;;  %s1549_s26 = scalar_lea.vmem %s2174_s17, 2048 }
 0x188   : > { %p1550_p11 = scmp.ne.s32.totalorder %s2174_s17, %s1549_s26 }
 0x18a   : > { %p1551_p12 = pnand %p1550_p11, %p1706_p5 }
 0x18b   : > { %917 = vrot.lane.b32.xlu0 %v914_v4, %s2274_s30  ;;  %1115 = vrot.lane.b32.xlu1 %v1113_v9, %s2277_s5  ;;  %s1555_s30 = scalar_lea.vmem %s1554_s28, 4096 }
 0x18c   : > { %p1552_p13 = pneg %p1551_p12  ;;  %p1557_p1 = scmp.lt.s32.totalorder %s1555_s30, %s1549_s26 }
 0x18e   : > { %p1558_p2 = por %p1557_p1, %p1556_p0 }
 0x18f   : > { %1142 = vrot.lane.b32.xlu0 %v1140_v12, %s2278_s7  ;;  %1169 = vrot.lane.b32.xlu1 %v1167_v11, %s2279_s9 }
 0x190   : > { %p1559_p3 = pnand %p1558_p2, %p1552_p13 }
 0x199   : > { %v479_v17 = vpop.permute.xlu1 %478 }
 0x19a   : > { %482 = vst.msk [vmem:[#allocation2 + $0x1c] sm:$0xf] %vm481_vm1, %v479_v17  ;;  %vm513_vm1 = vcmask 424960  }
 0x1a5   : > { %v576_v19 = vpop.permute.xlu0 %575 }
 0x1a6   : > { %579 = vst.msk [vmem:[#allocation2 + $0x28] sm:$0xf] %vm578_vm2, %v576_v19  ;;  %vm349_vm2 = vcmask 1043584  }
 0x1a9   : > { %v673_v20 = vpop.permute.xlu1 %672 }
 0x1aa   : > { %676 = vst.msk [vmem:[#allocation2 + $0x34] sm:$0xf] %vm675_vm3, %v673_v20  ;;  %vm516_vm3 = vcmask 1043744  }
 0x1ad   : > { %v735_v3 = vpop.permute.xlu0 %734 }
 0x1ae   : > { %738 = vst.msk [vmem:[#allocation2 + $0x3c] sm:$0xf] %vm737_vm4, %v735_v3  ;;  %vm548_vm4 = vcmask 752640  }
 0x1b1   : > { %v859_v21 = vpop.permute.xlu0 %858  ;;  %v797_v23 = vpop.permute.xlu1 %796 }
 0x1b2   : > { %862 = vst.msk [vmem:[#allocation2 + $0x4c] sm:$0xf] %vm861_vm5, %v859_v21  ;;  %vm384_vm5 = vcmask 1043616  }
 0x1b3   : > { %800 = vst.msk [vmem:[#allocation2 + $0x44] sm:$0xf] %vm799_vm6, %v797_v23  ;;  %vm551_vm6 = vcmask 1043776  }
 0x1b5   : > { %v886_v24 = vpop.permute.xlu1 %885 }
 0x1b6   : > { %889 = vst.msk [vmem:[#allocation2 + $0x50] sm:$0xf] %vm888_vm7, %v886_v24  ;;  %vm416_vm7 = vcmask 687104  }
 0x1b9   : > { %v946_v14 = vpop.permute.xlu0 %945  ;;  %v973_v25 = vpop.permute.xlu1 %972 }
 0x1ba   : > { %949 = vst.msk [vmem:[#allocation2 + $0x58] sm:$0xf] %vm948_vm8, %v946_v14  ;;  %vm610_vm8 = vcmask 457728  }
 0x1bb   : > { %976 = vst.msk [vmem:[#allocation2 + $0x5c] sm:$0xf] %vm975_vm9, %v973_v25  ;;  %vm419_vm9 = vcmask 1043648  }
 0x1bd   : > { %v1000_v26 = vpop.permute.xlu0 %999  ;;  %v273_v27 = vpop.permute.xlu1 %272 }
 0x1be   : > { %1003 = vst.msk [vmem:[#allocation2 + $0x60] sm:$0xf] %vm1002_vm10, %v1000_v26  ;;  %vm613_vm10 = vcmask 1043840  }
 0x1c1   : > { %v510_v28 = vpop.permute.xlu0 %509  ;;  %v308_v29 = vpop.permute.xlu1 %307 }
 0x1c2   : > { %v2045_v14 = vld [vmem:[#allocation2 + $0x58] sm:$0xff] }
 0x1c5   : > { %v545_v8 = vpop.permute.xlu0 %544  ;;  %v343_v30 = vpop.permute.xlu1 %342 }
 0x1c9   : > { %v607_v13 = vpop.permute.xlu0 %606  ;;  %v378_v31 = vpop.permute.xlu1 %377 }
 0x1cd   : > { %v704_v33 = vpop.permute.xlu0 %703  ;;  %v413_v34 = vpop.permute.xlu1 %412 }
 0x1d1   : > { %v1995_v35 = vpop.permute.xlu0 %827  ;;  %v448_v36 = vpop.permute.xlu1 %447 }
 0x1d5   : > { %v1997_v5 = vpop.permute.xlu0 %1030  ;;  %v1999_v38 = vpop.permute.xlu1 %641 }
 0x1d9   : > { %v275_v18 = vpop.permute.xlu0 %274  ;;  %v2001_v39 = vpop.permute.xlu1 %765 }
 0x1da   : > { %v277_v40 = vsel %vm276_vm14, %v273_v27, %v275_v18  ;;  %vm381_vm14 = vcmask 490496  }
 0x1db   : > { %280 = vst.msk [vmem:[#allocation2 + $0x4] sm:$0xf] %vm279_vm11, %v277_v40  ;;  %vm451_vm11 = vcmask 916480  }
 0x1dd   : > { %v310_v41 = vpop.permute.xlu0 %309  ;;  %v2004_v42 = vpop.permute.xlu1 %915 }
 0x1de   : > { %v312_v43 = vsel %vm311_vm12, %v308_v29, %v310_v41  ;;  %vm707_vm12 = vcmask 785408   ;;  %v1190_v29 = vlaneseq }
 0x1df   : > { %315 = vst.msk [vmem:[#allocation2 + $0x8] sm:$0xf] %vm314_vm13, %v312_v43  ;;  %vm454_vm13 = vcmask 1043680  }
 0x1e1   : > { %v345_v16 = vpop.permute.xlu0 %344  ;;  %v512_v37 = vpop.permute.xlu1 %511 }
 0x1e2   : > { %v347_v44 = vsel %vm346_vm15, %v343_v30, %v345_v16  ;;  %v514_v45 = vsel %vm513_vm1, %v510_v28, %v512_v37  ;;  %v2006_v15 = vld [vmem:[#allocation2] sm:$0xff]  ;;  %vm710_vm15 = vcmask 1043936   ;;  %vm645_vm1 = vcmask 883712  }
 0x1e3   : > { %350 = vst.msk [vmem:[#allocation2 + $0xc] sm:$0xf] %vm349_vm2, %v347_v44  ;;  %1242 = vxpose.xlu0.b32.start [1/16] %v2006_v15, 128  ;;  %vm831_vm2 = vcmask 982016   ;;  %v2062_v30 = vand.u32 127, %v1190_v29 }
 0x1e4   : > { %517 = vst.msk [vmem:[#allocation2 + $0x20] sm:$0xf] %vm516_vm3, %v514_v45  ;;  %vm648_vm3 = vcmask 1043872  }
 0x1e5   : > { %v380_v46 = vpop.permute.xlu0 %379  ;;  %v547_v47 = vpop.permute.xlu1 %546 }
 0x1e6   : > { %v382_v48 = vsel %vm381_vm14, %v378_v31, %v380_v46  ;;  %v549_v22 = vsel %vm548_vm4, %v545_v8, %v547_v47  ;;  %vm834_vm14 = vcmask 1044064   ;;  %vm769_vm4 = vcmask 818176  }
 0x1e7   : > { %385 = vst.msk [vmem:[#allocation2 + $0x10] sm:$0xf] %vm384_vm5, %v382_v48  ;;  %vm1064_vm5 = vcmask 1044320   ;;  %v2060_v8 = vshrl.u32 %v1190_v29, 7 }
 0x1e8   : > { %552 = vst.msk [vmem:[#allocation2 + $0x24] sm:$0xf] %vm551_vm6, %v549_v22  ;;  %vm772_vm6 = vcmask 1044000  }
 0x1e9   : > { %v415_v49 = vpop.permute.xlu0 %414  ;;  %v609_v50 = vpop.permute.xlu1 %608  ;;  %v1192_v31 = vadd.s32 8, %v2060_v8  ;;  %v1195_v43 = vadd.s32 32, %v2060_v8  ;;  %v1196_v45 = vadd.s32 40, %v2060_v8  ;;  %v1197_v48 = vadd.s32 48, %v2060_v8 }
 0x1ea   : > { %v417_v51 = vsel %vm416_vm7, %v413_v34, %v415_v49  ;;  %v611_v52 = vsel %vm610_vm8, %v607_v13, %v609_v50  ;;  %v2009_v53 = vld [vmem:[#allocation2 + $0x8] sm:$0xff]  ;;  %vm1091_vm7 = vcmask 1044352   ;;  %vm1034_vm8 = vcmask 1014784   ;;  %v2068_v13 = vld [vmem:[%s1761_s4] ss:$0 sm:$0xff]  ;;  %s1473_s4 = sshll.u32 %s1689_s16, 11 }
 0x1eb   : > { %420 = vst.msk [vmem:[#allocation2 + $0x14] sm:$0xf] %vm419_vm9, %v417_v51  ;;  %1243 = vxpose.xlu0.b32.cont [2/16] %v2009_v53, 128  ;;  %vm1037_vm9 = vcmask 1044288   ;;  %v1198_v51 = vadd.s32 56, %v2060_v8  ;;  %v1206_v29 = vadd.s32 120, %v2060_v8  ;;  %s2171_s25 = scalar_lea.hbm %s2225_s3, %s1473_s4  ;;  %s2180_s16 = scalar_lea.sflag [#allocation4], %s187_s6 }
 0x1ec   : > { %614 = vst.msk [vmem:[#allocation2 + $0x2c] sm:$0xf] %vm613_vm10, %v611_v52  ;;  %vm1118_vm10 = vcmask 1044384  }
 0x1ed   : > { %v450_v54 = vpop.permute.xlu0 %449  ;;  %v706_v55 = vpop.permute.xlu1 %705 }
 0x1ee   : > { %v452_v56 = vsel %vm451_vm11, %v448_v36, %v450_v54  ;;  %v708_v57 = vsel %vm707_vm12, %v704_v33, %v706_v55  ;;  %vm921_vm11 = vcmask 1044160   ;;  %vm1145_vm12 = vcmask 1044416  }
 0x1ef   : > { %455 = vst.msk [vmem:[#allocation2 + $0x18] sm:$0xf] %vm454_vm13, %v452_v56  ;;  %v2022_v6 = vld [vmem:[#allocation2 + $0x20] sm:$0xff]  ;;  %vm1172_vm13 = vcmask 1044448   ;;  %v1193_v36 = vadd.s32 16, %v2060_v8  ;;  %v1199_v55 = vadd.s32 64, %v2060_v8 }
 0x1f0   : > { %711 = vst.msk [vmem:[#allocation2 + $0x38] sm:$0xf] %vm710_vm15, %v708_v57  ;;  %vm1210_vm15 = vcmp.lt.s32.totalorder %v2060_v8, %v2062_v30 }
 0x1f1   : > { %v644_v58 = vpop.permute.xlu0 %643  ;;  %v830_v59 = vpop.permute.xlu1 %829 }
 0x1f2   : > { %v646_v60 = vsel %vm645_vm1, %v1999_v38, %v644_v58  ;;  %v832_v61 = vsel %vm831_vm2, %v1995_v35, %v830_v59  ;;  %v2014_v62 = vld [vmem:[#allocation2 + $0x10] sm:$0xff]  ;;  %vm1227_vm1 = vcmp.gt.s32.totalorder %v1192_v31, %v2062_v30  ;;  %vm1211_vm2 = vcmp.lt.s32.totalorder %v1192_v31, %v2062_v30 }
 0x1f3   : > { %649 = vst.msk [vmem:[#allocation2 + $0x30] sm:$0xf] %vm648_vm3, %v646_v60  ;;  %1244 = vxpose.xlu0.b32.cont [3/16] %v2014_v62, 128  ;;  %v2027_v12 = vld [vmem:[#allocation2 + $0x28] sm:$0xff]  ;;  %vm1228_vm3 = vcmp.gt.s32.totalorder %v1193_v36, %v2062_v30  ;;  %v1200_v59 = vadd.s32 72, %v2060_v8 }
 0x1f4   : > { %835 = vst.msk [vmem:[#allocation2 + $0x48] sm:$0xf] %vm834_vm14, %v832_v61  ;;  %vm1212_vm14 = vcmp.lt.s32.totalorder %v1193_v36, %v2062_v30 }
 0x1f5   : > { %v768_v63 = vpop.permute.xlu0 %767  ;;  %v1062_v32 = vpop.permute.xlu1 %1061 }
 0x1f6   : > { %v770_v0 = vsel %vm769_vm4, %v2001_v39, %v768_v63  ;;  %1065 = vst.msk [vmem:[#allocation2 + $0x68] sm:$0xf] %vm1064_vm5, %v1062_v32  ;;  %v2018_v1 = vld [vmem:[#allocation2 + $0x18] sm:$0xff]  ;;  %v1194_v39 = vadd.s32 24, %v2060_v8  ;;  %v1201_v63 = vadd.s32 80, %v2060_v8 }
 0x1f7   : > { %773 = vst.msk [vmem:[#allocation2 + $0x40] sm:$0xf] %vm772_vm6, %v770_v0  ;;  %1245 = vxpose.xlu0.b32.cont [4/16] %v2018_v1, 128  ;;  %v2033_v3 = vld [vmem:[#allocation2 + $0x38] sm:$0xff]  ;;  %vm1230_vm6 = vcmp.gt.s32.totalorder %v1195_v43, %v2062_v30 }
 0x1f8   : > { %vm1229_vm4 = vcmp.gt.s32.totalorder %v1194_v39, %v2062_v30  ;;  %vm1213_vm5 = vcmp.lt.s32.totalorder %v1194_v39, %v2062_v30 }
 0x1f9   : > { %v1089_v2 = vpop.permute.xlu0 %1088  ;;  %v1033_v4 = vpop.permute.xlu1 %1032 }
 0x1fa   : > { %1092 = vst.msk [vmem:[#allocation2 + $0x6c] sm:$0xf] %vm1091_vm7, %v1089_v2  ;;  %v1035_v9 = vsel %vm1034_vm8, %v1997_v5, %v1033_v4  ;;  %v2030_v20 = vld [vmem:[#allocation2 + $0x30] sm:$0xff]  ;;  %vm1214_vm7 = vcmp.lt.s32.totalorder %v1195_v43, %v2062_v30  ;;  %vm1231_vm8 = vcmp.gt.s32.totalorder %v1196_v45, %v2062_v30  ;;  %v1202_v2 = vadd.s32 88, %v2060_v8 }
 0x1fb   : > { %1038 = vst.msk [vmem:[#allocation2 + $0x64] sm:$0xf] %vm1037_vm9, %v1035_v9  ;;  %1246 = vxpose.xlu0.b32.cont [5/16] %v2022_v6, 128  ;;  %v2039_v23 = vld [vmem:[#allocation2 + $0x48] sm:$0xff]  ;;  %vm1215_vm9 = vcmp.lt.s32.totalorder %v1196_v45, %v2062_v30 }
 0x1fd   : > { %v918_v10 = vpop.permute.xlu0 %917  ;;  %v1116_v7 = vpop.permute.xlu1 %1115 }
 0x1fe   : > { %v919_v11 = vsel %vm266_vm0, %v2004_v42, %v918_v10  ;;  %1119 = vst.msk [vmem:[#allocation2 + $0x70] sm:$0xf] %vm1118_vm10, %v1116_v7  ;;  %v2036_v21 = vld [vmem:[#allocation2 + $0x40] sm:$0xff]  ;;  %vm1226_vm0 = vcmp.gt.s32.totalorder %v2060_v8, %v2062_v30  ;;  %vm1232_vm10 = vcmp.gt.s32.totalorder %v1197_v48, %v2062_v30  ;;  %v1203_v10 = vadd.s32 96, %v2060_v8 }
 0x1ff   : > { %922 = vst.msk [vmem:[#allocation2 + $0x54] sm:$0xf] %vm921_vm11, %v919_v11  ;;  %1247 = vxpose.xlu0.b32.cont [6/16] %v2027_v12, 128  ;;  %vm1216_vm11 = vcmp.lt.s32.totalorder %v1197_v48, %v2062_v30 }
 0x201   : > { %v1143_v17 = vpop.permute.xlu0 %1142  ;;  %v1170_v19 = vpop.permute.xlu1 %1169  ;;  %v2051_v26 = vld [vmem:[#allocation2 + $0x68] sm:$0xff] }
 0x202   : > { %1146 = vst.msk [vmem:[#allocation2 + $0x74] sm:$0xf] %vm1145_vm12, %v1143_v17  ;;  %v2048_v25 = vld [vmem:[#allocation2 + $0x60] sm:$0xff]  ;;  %vm1233_vm12 = vcmp.gt.s32.totalorder %v1198_v51, %v2062_v30  ;;  %v1204_v17 = vadd.s32 104, %v2060_v8 }
 0x203   : > { %1173 = vst.msk [vmem:[#allocation2 + $0x78] sm:$0xf] %vm1172_vm13, %v1170_v19  ;;  %1248 = vxpose.xlu0.b32.cont [7/16] %v2030_v20, 128  ;;  %vm1217_vm13 = vcmp.lt.s32.totalorder %v1198_v51, %v2062_v30 }
 0x206   : > { %v2042_v24 = vld [vmem:[#allocation2 + $0x50] sm:$0xff] }
 0x207   : > { %1249 = vxpose.xlu0.b32.cont [8/16] %v2033_v3, 128 }
 0x209   : > { %v2054_v27 = vld [vmem:[#allocation2 + $0x70] sm:$0xff] }
 0x20a   : > { %v2057_v28 = vld [vmem:[#allocation2 + $0x78] sm:$0xff] }
 0x20b   : > { %1250 = vxpose.xlu0.b32.cont [9/16] %v2036_v21, 128 }
 0x20f   : > { %1251 = vxpose.xlu0.b32.cont [10/16] %v2039_v23, 128 }
 0x213   : > { %1252 = vxpose.xlu0.b32.cont [11/16] %v2042_v24, 128 }
 0x217   : > { %1253 = vxpose.xlu0.b32.cont [12/16] %v2045_v14, 128 }
 0x21b   : > { %1254 = vxpose.xlu0.b32.cont [13/16] %v2048_v25, 128 }
 0x21f   : > { %1255 = vxpose.xlu0.b32.cont [14/16] %v2051_v26, 128 }
 0x223   : > { %1256 = vxpose.xlu0.b32.cont [15/16] %v2054_v27, 128 }
 0x227   : > { %1257 = vxpose.xlu0.b32.end [16/16] %v2057_v28, 128 }
 0x26b   : > { %v1258_v33 = vpop.trf.xlu0 }
 0x26c   : > { %v1280_v34 = vsel %vm1226_vm0, %v1258_v33, %v2068_v13  ;;  %vm1234_vm0 = vcmp.gt.s32.totalorder %v1199_v55, %v2062_v30 }
 0x26d   : > { %v1296_v35 = vsel %vm1210_vm15, %v2006_v15, %v1280_v34  ;;  %vm1218_vm15 = vcmp.lt.s32.totalorder %v1199_v55, %v2062_v30 }
 0x26e   : > { %1312 = vst [vmem:[%s2079_s11] sm:$0xff] %v1296_v35 }
 0x26f   : > { %v1259_v5 = vpop.trf.xlu0 }
 0x270   : > { %v1281_v38 = vsel %vm1227_vm1, %v1259_v5, %v2068_v13  ;;  %vm1235_vm1 = vcmp.gt.s32.totalorder %v1200_v59, %v2062_v30 }
 0x271   : > { %v1297_v18 = vsel %vm1211_vm2, %v2009_v53, %v1281_v38  ;;  %vm1219_vm2 = vcmp.lt.s32.totalorder %v1200_v59, %v2062_v30 }
 0x272   : > { %1313 = vst [vmem:[%s2079_s11 + $0x8] sm:$0xff] %v1297_v18 }
 0x273   : > { %v1260_v40 = vpop.trf.xlu0 }
 0x274   : > { %v1282_v41 = vsel %vm1228_vm3, %v1260_v40, %v2068_v13  ;;  %vm1236_vm3 = vcmp.gt.s32.totalorder %v1201_v63, %v2062_v30 }
 0x275   : > { %v1298_v42 = vsel %vm1212_vm14, %v2014_v62, %v1282_v41  ;;  %vm1220_vm14 = vcmp.lt.s32.totalorder %v1201_v63, %v2062_v30 }
 0x276   : > { %1314 = vst [vmem:[%s2079_s11 + $0x10] sm:$0xff] %v1298_v42 }
 0x277   : > { %v1261_v16 = vpop.trf.xlu0 }
 0x278   : > { %v1283_v37 = vsel %vm1229_vm4, %v1261_v16, %v2068_v13  ;;  %vm1237_vm4 = vcmp.gt.s32.totalorder %v1202_v2, %v2062_v30 }
 0x279   : > { %v1299_v44 = vsel %vm1213_vm5, %v2018_v1, %v1283_v37  ;;  %vm1221_vm5 = vcmp.lt.s32.totalorder %v1202_v2, %v2062_v30 }
 0x27a   : > { %1315 = vst [vmem:[%s2079_s11 + $0x18] sm:$0xff] %v1299_v44 }
 0x27b   : > { %v1262_v15 = vpop.trf.xlu0 }
 0x27c   : > { %v1284_v46 = vsel %vm1230_vm6, %v1262_v15, %v2068_v13  ;;  %vm1238_vm6 = vcmp.gt.s32.totalorder %v1203_v10, %v2062_v30 }
 0x27d   : > { %v1300_v47 = vsel %vm1214_vm7, %v2022_v6, %v1284_v46  ;;  %vm1222_vm7 = vcmp.lt.s32.totalorder %v1203_v10, %v2062_v30 }
 0x27e   : > { %1316 = vst [vmem:[%s2079_s11 + $0x20] sm:$0xff] %v1300_v47 }
 0x27f   : > { %v1263_v22 = vpop.trf.xlu0 }
 0x280   : > { %v1285_v49 = vsel %vm1231_vm8, %v1263_v22, %v2068_v13  ;;  %vm1239_vm8 = vcmp.gt.s32.totalorder %v1204_v17, %v2062_v30 }
 0x281   : > { %v1301_v50 = vsel %vm1215_vm9, %v2027_v12, %v1285_v49  ;;  %vm1223_vm9 = vcmp.lt.s32.totalorder %v1204_v17, %v2062_v30 }
 0x282   : > { %1317 = vst [vmem:[%s2079_s11 + $0x28] sm:$0xff] %v1301_v50 }
 0x283   : > { %v1264_v52 = vpop.trf.xlu0 }
 0x284   : > { %v1286_v53 = vsel %vm1232_vm10, %v1264_v52, %v2068_v13 }
 0x285   : > { %v1302_v54 = vsel %vm1216_vm11, %v2030_v20, %v1286_v53 }
 0x286   : > { %1318 = vst [vmem:[%s2079_s11 + $0x30] sm:$0xff] %v1302_v54 }
 0x287   : > { %v1265_v56 = vpop.trf.xlu0 }
 0x288   : > { %v1287_v57 = vsel %vm1233_vm12, %v1265_v56, %v2068_v13  ;;  %vm1241_vm12 = vcmp.gt.s32.totalorder %v1206_v29, %v2062_v30 }
 0x289   : > { %v1303_v58 = vsel %vm1217_vm13, %v2033_v3, %v1287_v57  ;;  %vm1225_vm13 = vcmp.lt.s32.totalorder %v1206_v29, %v2062_v30 }
 0x28a   : > { %1319 = vst [vmem:[%s2079_s11 + $0x38] sm:$0xff] %v1303_v58 }
 0x28b   : > { %v1266_v60 = vpop.trf.xlu0 }
 0x28c   : > { %v1288_v61 = vsel %vm1234_vm0, %v1266_v60, %v2068_v13 }
 0x28d   : > { %v1304_v62 = vsel %vm1218_vm15, %v2036_v21, %v1288_v61  ;;  %v1205_v21 = vadd.s32 112, %v2060_v8 }
 0x28e   : > { %1320 = vst [vmem:[%s2079_s11 + $0x40] sm:$0xff] %v1304_v62 }
 0x28f   : > { %v1267_v32 = vpop.trf.xlu0  ;;  %vm1240_vm10 = vcmp.gt.s32.totalorder %v1205_v21, %v2062_v30  ;;  %vm1224_vm11 = vcmp.lt.s32.totalorder %v1205_v21, %v2062_v30 }
 0x290   : > { %v1289_v0 = vsel %vm1235_vm1, %v1267_v32, %v2068_v13 }
 0x291   : > { %v1305_v1 = vsel %vm1219_vm2, %v2039_v23, %v1289_v0 }
 0x292   : > { %1321 = vst [vmem:[%s2079_s11 + $0x48] sm:$0xff] %v1305_v1 }
 0x293   : > { %v1268_v4 = vpop.trf.xlu0 }
 0x294   : > { %v1290_v9 = vsel %vm1236_vm3, %v1268_v4, %v2068_v13 }
 0x295   : > { %v1306_v6 = vsel %vm1220_vm14, %v2042_v24, %v1290_v9 }
 0x296   : > { %1322 = vst [vmem:[%s2079_s11 + $0x50] sm:$0xff] %v1306_v6 }
 0x297   : > { %v1269_v7 = vpop.trf.xlu0 }
 0x298   : > { %v1291_v11 = vsel %vm1237_vm4, %v1269_v7, %v2068_v13 }
 0x299   : > { %v1307_v12 = vsel %vm1221_vm5, %v2045_v14, %v1291_v11 }
 0x29a   : > { %1323 = vst [vmem:[%s2079_s11 + $0x58] sm:$0xff] %v1307_v12 }
 0x29b   : > { %v1270_v19 = vpop.trf.xlu0 }
 0x29c   : > { %v1292_v20 = vsel %vm1238_vm6, %v1270_v19, %v2068_v13 }
 0x29d   : > { %v1308_v3 = vsel %vm1222_vm7, %v2048_v25, %v1292_v20 }
 0x29e   : > { %1324 = vst [vmem:[%s2079_s11 + $0x60] sm:$0xff] %v1308_v3 }
 0x29f   : > { %v1271_v23 = vpop.trf.xlu0 }
 0x2a0   : > { %v1293_v24 = vsel %vm1239_vm8, %v1271_v23, %v2068_v13 }
 0x2a1   : > { %v1309_v14 = vsel %vm1223_vm9, %v2051_v26, %v1293_v24 }
 0x2a2   : > { %1325 = vst [vmem:[%s2079_s11 + $0x68] sm:$0xff] %v1309_v14 }
 0x2a3   : > { %v1272_v25 = vpop.trf.xlu0 }
 0x2a4   : > { %v1294_v31 = vsel %vm1240_vm10, %v1272_v25, %v2068_v13 }
 0x2a5   : > { %v1310_v33 = vsel %vm1224_vm11, %v2054_v27, %v1294_v31 }
 0x2a6   : > { %1326 = vst [vmem:[%s2079_s11 + $0x70] sm:$0xff] %v1310_v33 }
 0x2a7   : > { %v1273_v26 = vpop.trf.xlu0 }
 0x2a8   : > { %v1295_v8 = vsel %vm1241_vm12, %v1273_v26, %v2068_v13 }
 0x2a9   : > { %v1311_v27 = vsel %vm1225_vm13, %v2057_v28, %v1295_v8 }
 0x2aa   : > { %1327 = vst [vmem:[%s2079_s11 + $0x78] sm:$0xff] %v1311_v27 }
 0x2ab   : > { %1562 = shalt.err (!%p1559_p3)
}
 0x2ac   : > { %s1563_s8 = scalar_lea.hbm %s2171_s25, 2048  ;;  %s1567_s7 = scalar_lea.hbm %s2225_s3, 4096 }
 0x2ad   : > { %p1564_p4 = scmp.ne.s32.totalorder %s2171_s25, %s1563_s8  ;;  %p1568_p9 = scmp.lt.u32.totalorder %s2171_s25, %s2225_s3 }
 0x2ae   : > { %p1569_p10 = scmp.lt.u32.totalorder %s1567_s7, %s1563_s8  ;;  %p1571_p12 = scmp.lt.u32.totalorder %s1563_s8, %s2171_s25 }
 0x2af   : > { %p1565_p7 = pnand %p1564_p4, %p1706_p5 }
 0x2b0   : > { %p1570_p11 = por %p1569_p10, %p1568_p9 }
 0x2b1   : > { %p1566_p8 = pneg %p1565_p7 }
 0x2b2   : > { %p1572_p13 = por %p1571_p12, %p1570_p11 }
 0x2b4   : > { %p1573_p0 = pnand %p1572_p13, %p1566_p8 }
 0x2b6   : > { %1576 = shalt.err (!%p1573_p0)
}
 0x2b7   : > { %s1647_s10 = smov 128  }
 0x2b8   : > { %1474 = dma.vmem_to_hbm [thread:$0]  (%p1706_p5), %s2174_s17, 2048, %s2171_s25, %s2180_s16, %s1647_s10, %s1647_s10, %s1628_s29  }
 0x2b9 PF: > { %p1480_p1 = scmp.ge.s32.totalorder %s1611_s15, 2  ;;  %s1357_s11 = sand.u32 1, %s1599_s12  }
 0x2ba   : > { %s1358_s4 = scalar_lea.sflag [#allocation4], %s1357_s11 }
 0x2bb   : > { %p1477_p2 = pnand %p1480_p1, %p1710_p6 }
 0x2bd   : > { %1594 = dma.done.wait (!%p1477_p2), %s1358_s4, 2048  }
 0x2be   : > { %1596 = vsyncadd (!%p1477_p2), %s1358_s4, 4294965248  ;;  %p13_p3 = scmp.ge.s32.totalorder %s1693_s18, 4   ;;  %s2280_s12 = smov %s1603_s13 }
 0x2bf   : > { %s2281_s13 = smov %s1607_s14  ;;  %s2282_s14 = smov %s1704_s21 }
 0x2c0   : > { %s2283_s15 = smov %s1693_s18  ;;  %15 = sbr.rel (!%p13_p3) target bundleno = 3 (0x3), region = 73 }
 0x2c7   :  { %1363 = vsyncpa [#allocation4], 1 }
 0x2c8   :  { %1365 = vsyncpa [#allocation4 + $0x1], 1 }

</bundles_post_ra>
